<compile_context>
chip_gen: v7x
topology: tpu7x:2x2x1
jax: 0.10.0
libtpu: 0.0.40
codegen_flags: <defaults>
</compile_context>

<pallas_src>
import functools

import numpy as np

import jax
import jax.numpy as jnp
from jax.experimental import pallas as pl
from jax.experimental.pallas import tpu as pltpu

EPS = 1e-5  # torch.nn.InstanceNorm2d default eps


def _up_doubleconv_kernel(x2_ref, x1_ref, u_ref, m_ref,
                          w1_ref, g1_ref, b1_ref, w2_ref, g2_ref, b2_ref,
                          o_ref, *, H, W, B, mm_dtype):
    """B samples of upsample+concat+DoubleConv, channel-major (C, B*H*W).

      x2_ref: (B, C2, H*W)    high-res skip input (flat spatial)
      x1_ref: (B, C1, h*w)    low-res input to be 2x nearest-upsampled
      u_ref : (h*w, H*W)      0/1 nearest-upsample selection matrix (resident)
      m_ref : (9, B*H*W)      3x3 'SAME' boundary masks, tiled over B (resident)
      w*_ref: (Cout, 9*Cin)   im2col weights; col = (ky*3+kx)*Cin + ci (resident)
      g*/b* : (C, 1)          InstanceNorm affine params
      o_ref : (B, Cout, H*W)
    """
    HW = H * W
    TOT = B * HW
    inv_hw = 1.0 / HW

    # tap order must match the wrapper's weight reshape: col = (ky*3+kx)*C + ci
    taps = [(oy, ox) for oy in (-1, 0, 1) for ox in (-1, 0, 1)]

    masks = m_ref[...]
    u_mat = u_ref[...]
    w1 = w1_ref[...]
    w2 = w2_ref[...]
    g1 = g1_ref[...]
    b1 = b1_ref[...]
    g2 = g2_ref[...]
    b2 = b2_ref[...]

    # ---- fused nearest(2x) upsample + torch.cat([x2, up(x1)], dim=1); samples
    # ---- are folded onto the lane axis -> (Cin, B*HW).
    slabs = []
    for b in range(B):  # B is small & static: full unroll
        x1u = jnp.dot(x1_ref[b], u_mat, preferred_element_type=jnp.float32)
        slabs.append(jnp.concatenate([x2_ref[b], x1u], axis=0))      # (Cin, HW)
    x = jnp.concatenate(slabs, axis=1) if B > 1 else slabs[0]        # (Cin, TOT)

    def conv3x3(v, wmat):
        # v: (C, B*HW) f32.  im2col via lane rolls (XLU) + resident masks
        # (VPU multiply, kept in f32), then a single MXU matmul with f32 acc.
        # Cross-sample wraps of the roll hit exactly the masked positions.
        parts = []
        for t, (oy, ox) in enumerate(taps):
            off = oy * W + ox
            p = pltpu.roll(v, shift=(-off) % TOT, axis=1) if off else v
            if oy or ox:
                p = p * masks[t:t + 1, :]
            parts.append(p.astype(mm_dtype))
        patches = jnp.concatenate(parts, axis=0)                     # (9*C, TOT)
        # TODO(synk): for large C*HW (deeper UNet stages, v7x 64MiB VMEM) split
        # this K=9*C contraction into 3 accumulating dots over tap-row groups.
        return jnp.dot(wmat, patches, preferred_element_type=jnp.float32)

    def inorm_relu(acc, g, bias):
        # per-(sample, channel) stats over the spatial lanes; single pass in
        # f32 with clamped variance.  Reductions kept on the XLU (proven
        # lowering); rolls, not reduces, dominate the XLU budget here.
        s = jnp.sum(acc, axis=1, keepdims=True)
        sq = jnp.sum(acc * acc, axis=1, keepdims=True)
        mean = s * inv_hw
        var = jnp.maximum(sq * inv_hw - mean * mean, 0.0)
        scale = g * jax.lax.rsqrt(var + EPS)
        shift = bias - mean * scale
        return jnp.maximum(acc * scale + shift, 0.0)

    a1 = conv3x3(x, w1)                                              # (Cmid, TOT)
    y = [inorm_relu(a1[:, b * HW:(b + 1) * HW], g1, b1) for b in range(B)]
    y = jnp.concatenate(y, axis=1) if B > 1 else y[0]

    a2 = conv3x3(y, w2)                                              # (Cout, TOT)
    for b in range(B):
        z = inorm_relu(a2[:, b * HW:(b + 1) * HW], g2, b2)
        o_ref[b] = z.astype(o_ref.dtype)


@functools.lru_cache(maxsize=None)
def _im2col_constants(h, w, B):
    """Nearest-2x upsample selection matrix + 3x3 'SAME' boundary masks."""
    H, W = 2 * h, 2 * w
    HW = H * W
    r = np.arange(HW) // W
    c = np.arange(HW) % W
    up = np.zeros((h * w, HW), np.float32)
    up[(r // 2) * w + (c // 2), np.arange(HW)] = 1.0
    masks = np.empty((9, HW), np.float32)
    t = 0
    for oy in (-1, 0, 1):
        for ox in (-1, 0, 1):
            valid = (r + oy >= 0) & (r + oy < H) & (c + ox >= 0) & (c + ox < W)
            masks[t] = valid
            t += 1
    return up, np.tile(masks, (1, B))


def prepare_up_params(params, matmul_dtype=jnp.float32):
    """Once-per-model parameter prep (hoisted out of the per-call wrapper)."""
    w1, g1, b1, w2, g2, b2 = params          # conv weights in HWIO
    Cin, Cmid = w1.shape[2], w1.shape[3]
    Cout = w2.shape[3]
    # HWIO -> (Cout, 9*Cin); column index = (ky*3 + kx)*Cin + ci, matching the
    # kernel's tap-major im2col row order (do NOT reorder one without the other).
    w1m = jnp.transpose(w1, (3, 0, 1, 2)).reshape(Cmid, 9 * Cin).astype(matmul_dtype)
    w2m = jnp.transpose(w2, (3, 0, 1, 2)).reshape(Cout, 9 * Cmid).astype(matmul_dtype)
    f32 = jnp.float32
    return (w1m, g1.reshape(-1, 1).astype(f32), b1.reshape(-1, 1).astype(f32),
            w2m, g2.reshape(-1, 1).astype(f32), b2.reshape(-1, 1).astype(f32))


def _pick_batch_block(N, Cin, HW):
    """Samples per grid step: amortize per-step overhead, keep >=2 grid steps
    (v7x megacore), and cap the per-step im2col footprint."""
    if N < 4 or N % 2:
        return 1
    B = N // 2
    cap = max(1, (4 << 20) // (9 * Cin * HW * 4))
    while B > cap:
        if B % 2:
            return 1
        B //= 2
    return B if N % B == 0 else 1


def up_forward(x1, x2, prepared, *, batch_block=None):
    """x1: (N, C1, h, w), x2: (N, C2, 2h, 2w) NCHW -> (N, Cout, 2h, 2w)."""
    w1m, g1, b1, w2m, g2, b2 = prepared
    N, C1, h, w = x1.shape
    _, C2, H, W = x2.shape
    assert H == 2 * h and W == 2 * w
    Cin = C1 + C2
    Cmid, Cout = w1m.shape[0], w2m.shape[0]
    assert w1m.shape[1] == 9 * Cin
    HW, hw = H * W, h * w

    B = batch_block if batch_block is not None else _pick_batch_block(N, Cin, HW)
    assert N % B == 0

    up_np, masks_np = _im2col_constants(h, w, B)
    u_mat = jnp.asarray(up_np)
    masks = jnp.asarray(masks_np)

    # free contiguous reshapes; upsample/concat happen inside the kernel.
    x1f = x1.reshape(N, C1, hw)
    x2f = x2.reshape(N, C2, HW)

    kernel = functools.partial(_up_doubleconv_kernel, H=H, W=W, B=B,
                               mm_dtype=w1m.dtype)
    resident = lambda arr: pl.BlockSpec(arr.shape, lambda n: (0, 0))
    out = pl.pallas_call(
        kernel,
        out_shape=jax.ShapeDtypeStruct((N, Cout, HW), jnp.float32),
        grid_spec=pltpu.PrefetchScalarGridSpec(
            num_scalar_prefetch=0,
            grid=(N // B,),
            in_specs=[
                pl.BlockSpec((B, C2, HW), lambda n: (n, 0, 0)),
                pl.BlockSpec((B, C1, hw), lambda n: (n, 0, 0)),
                resident(u_mat), resident(masks),
                resident(w1m), resident(g1), resident(b1),
                resident(w2m), resident(g2), resident(b2),
            ],
            out_specs=pl.BlockSpec((B, Cout, HW), lambda n: (n, 0, 0)),
        ),
        compiler_params=pltpu.CompilerParams(
            dimension_semantics=("parallel",)),
    )(x2f, x1f, u_mat, masks, w1m, g1, b1, w2m, g2, b2)

    # free contiguous reshape back to NCHW -- no transpose needed.
    return out.reshape(N, Cout, H, W)


def ref_forward(x1, x2, params):
    """Pure-JAX reference (same semantics as the PyTorch module)."""
    w1, g1, b1, w2, g2, b2 = params
    x1u = jnp.repeat(jnp.repeat(x1, 2, axis=2), 2, axis=3)
    x = jnp.concatenate([x2, x1u], axis=1)
    x = jnp.transpose(x, (0, 2, 3, 1))

    def block(x, w, g, b):
        y = jax.lax.conv_general_dilated(
            x, w, (1, 1), 'SAME',
            dimension_numbers=('NHWC', 'HWIO', 'NHWC'))
        mean = jnp.mean(y, axis=(1, 2), keepdims=True)
        var = jnp.mean((y - mean) ** 2, axis=(1, 2), keepdims=True)
        y = (y - mean) * jax.lax.rsqrt(var + EPS)
        y = y * g + b
        return jnp.maximum(y, 0.0)

    y = block(x, w1, g1, b1)
    y = block(y, w2, g2, b2)
    return jnp.transpose(y, (0, 3, 1, 2))


if __name__ == "__main__":
    key = jax.random.PRNGKey(0)
    ks = jax.random.split(key, 8)

    # Up(in_channels=8, out_channels=8): x1 has 4 ch @ 8x8, x2 has 4 ch @ 16x16
    N, C1, C2 = 4, 4, 4
    h, w = 8, 8
    Cin, Cmid, Cout = C1 + C2, 8, 8

    x1 = jax.random.normal(ks[0], (N, C1, h, w), jnp.float32)
    x2 = jax.random.normal(ks[1], (N, C2, 2 * h, 2 * w), jnp.float32)

    w1 = jax.random.normal(ks[2], (3, 3, Cin, Cmid), jnp.float32) * 0.1
    w2 = jax.random.normal(ks[3], (3, 3, Cmid, Cout), jnp.float32) * 0.1
    # non-trivial InstanceNorm affine params to actually exercise affine=True
    g1 = 1.0 + 0.1 * jax.random.normal(ks[4], (Cmid,), jnp.float32)
    b1 = 0.1 * jax.random.normal(ks[5], (Cmid,), jnp.float32)
    g2 = 1.0 + 0.1 * jax.random.normal(ks[6], (Cout,), jnp.float32)
    b2 = 0.1 * jax.random.normal(ks[7], (Cout,), jnp.float32)
    params = (w1, g1, b1, w2, g2, b2)

    ref = ref_forward(x1, x2, params)
    fwd = jax.jit(up_forward, static_argnames=("batch_block",))

    # f32 MXU operands: tight agreement with the f32 reference.
    out = jax.block_until_ready(fwd(x1, x2, prepare_up_params(params)))
    assert out.shape == (N, Cout, 2 * h, 2 * w), out.shape
    err = float(jnp.max(jnp.abs(out - ref)))
    assert jnp.allclose(out, ref, atol=1e-3, rtol=1e-3), err

    # bf16 MXU operands (recommended on v6e/v7x): f32 accumulation / norm.
    out_bf16 = jax.block_until_ready(
        fwd(x1, x2, prepare_up_params(params, matmul_dtype=jnp.bfloat16)))
    err_bf16 = float(jnp.max(jnp.abs(out_bf16 - ref)))
    assert jnp.allclose(out_bf16, ref, atol=5e-2, rtol=5e-2), err_bf16

    print("KERNEL_OK")
</pallas_src>

<mosaic_0001>
module attributes {stable_mosaic.version = 11 : i64} {
  func.func @_up_doubleconv_kernel(%arg0: i32, %arg1: memref<2x4x256xf32, #tpu.memory_space<vmem>>, %arg2: memref<2x4x64xf32, #tpu.memory_space<vmem>>, %arg3: memref<64x256xf32, #tpu.memory_space<vmem>>, %arg4: memref<9x512xf32, #tpu.memory_space<vmem>>, %arg5: memref<8x72xf32, #tpu.memory_space<vmem>>, %arg6: memref<8x1xf32, #tpu.memory_space<vmem>>, %arg7: memref<8x1xf32, #tpu.memory_space<vmem>>, %arg8: memref<8x72xf32, #tpu.memory_space<vmem>>, %arg9: memref<8x1xf32, #tpu.memory_space<vmem>>, %arg10: memref<8x1xf32, #tpu.memory_space<vmem>>, %arg11: memref<2x8x256xf32, #tpu.memory_space<vmem>>) attributes {dimension_semantics = [#tpu.dimension_semantics<parallel>], iteration_bounds = array<i64: 2>, scalar_prefetch = 0 : i64, scratch_operands = 0 : i64, tpu.core_type = #tpu.core_type<tc>, window_params = [{transform_indices = @transform_0, window_bounds = array<i64: 2, 4, 256>}, {transform_indices = @transform_1, window_bounds = array<i64: 2, 4, 64>}, {pipeline_mode = #tpu.pipeline_mode<synchronous>, transform_indices = @transform_2, window_bounds = array<i64: 64, 256>}, {pipeline_mode = #tpu.pipeline_mode<synchronous>, transform_indices = @transform_3, window_bounds = array<i64: 9, 512>}, {pipeline_mode = #tpu.pipeline_mode<synchronous>, transform_indices = @transform_4, window_bounds = array<i64: 8, 72>}, {pipeline_mode = #tpu.pipeline_mode<synchronous>, transform_indices = @transform_5, window_bounds = array<i64: 8, 1>}, {pipeline_mode = #tpu.pipeline_mode<synchronous>, transform_indices = @transform_6, window_bounds = array<i64: 8, 1>}, {pipeline_mode = #tpu.pipeline_mode<synchronous>, transform_indices = @transform_7, window_bounds = array<i64: 8, 72>}, {pipeline_mode = #tpu.pipeline_mode<synchronous>, transform_indices = @transform_8, window_bounds = array<i64: 8, 1>}, {pipeline_mode = #tpu.pipeline_mode<synchronous>, transform_indices = @transform_9, window_bounds = array<i64: 8, 1>}, {transform_indices = @transform_10, window_bounds = array<i64: 2, 8, 256>}]} {
    %c0 = arith.constant 0 : index
    %c0_0 = arith.constant 0 : index
    %0 = vector.load %arg4[%c0, %c0_0] : memref<9x512xf32, #tpu.memory_space<vmem>>, vector<9x512xf32>
    %c0_1 = arith.constant 0 : index
    %c0_2 = arith.constant 0 : index
    %1 = vector.load %arg3[%c0_1, %c0_2] : memref<64x256xf32, #tpu.memory_space<vmem>>, vector<64x256xf32>
    %c0_3 = arith.constant 0 : index
    %c0_4 = arith.constant 0 : index
    %2 = vector.load %arg5[%c0_3, %c0_4] : memref<8x72xf32, #tpu.memory_space<vmem>>, vector<8x72xf32>
    %c0_5 = arith.constant 0 : index
    %c0_6 = arith.constant 0 : index
    %3 = vector.load %arg8[%c0_5, %c0_6] : memref<8x72xf32, #tpu.memory_space<vmem>>, vector<8x72xf32>
    %c0_7 = arith.constant 0 : index
    %c0_8 = arith.constant 0 : index
    %4 = vector.load %arg6[%c0_7, %c0_8] : memref<8x1xf32, #tpu.memory_space<vmem>>, vector<8x1xf32>
    %c0_9 = arith.constant 0 : index
    %c0_10 = arith.constant 0 : index
    %5 = vector.load %arg7[%c0_9, %c0_10] : memref<8x1xf32, #tpu.memory_space<vmem>>, vector<8x1xf32>
    %c0_11 = arith.constant 0 : index
    %c0_12 = arith.constant 0 : index
    %6 = vector.load %arg9[%c0_11, %c0_12] : memref<8x1xf32, #tpu.memory_space<vmem>>, vector<8x1xf32>
    %c0_13 = arith.constant 0 : index
    %c0_14 = arith.constant 0 : index
    %7 = vector.load %arg10[%c0_13, %c0_14] : memref<8x1xf32, #tpu.memory_space<vmem>>, vector<8x1xf32>
    %c0_15 = arith.constant 0 : index
    %c0_16 = arith.constant 0 : index
    %c0_17 = arith.constant 0 : index
    %8 = vector.load %arg2[%c0_15, %c0_16, %c0_17] : memref<2x4x64xf32, #tpu.memory_space<vmem>>, vector<1x4x64xf32>
    %9 = vector.shape_cast %8 : vector<1x4x64xf32> to vector<4x64xf32>
    %cst = arith.constant dense<0.000000e+00> : vector<4x256xf32>
    %10 = tpu.matmul %9, %1, %cst {dimension_numbers = #tpu.dot_dimension_numbers<[1], [0], [0], [1], [0, 0, 1, 1], [], []>} : vector<4x64xf32>, vector<64x256xf32>, vector<4x256xf32> -> vector<4x256xf32>
    %c0_18 = arith.constant 0 : index
    %c0_19 = arith.constant 0 : index
    %c0_20 = arith.constant 0 : index
    %11 = vector.load %arg1[%c0_18, %c0_19, %c0_20] : memref<2x4x256xf32, #tpu.memory_space<vmem>>, vector<1x4x256xf32>
    %12 = vector.shape_cast %11 : vector<1x4x256xf32> to vector<4x256xf32>
    %13 = tpu.concatenate %12, %10 in 0 : vector<4x256xf32>, vector<4x256xf32> -> vector<8x256xf32>
    %c1 = arith.constant 1 : index
    %c0_21 = arith.constant 0 : index
    %c0_22 = arith.constant 0 : index
    %14 = vector.load %arg2[%c1, %c0_21, %c0_22] : memref<2x4x64xf32, #tpu.memory_space<vmem>>, vector<1x4x64xf32>
    %15 = vector.shape_cast %14 : vector<1x4x64xf32> to vector<4x64xf32>
    %cst_23 = arith.constant dense<0.000000e+00> : vector<4x256xf32>
    %16 = tpu.matmul %15, %1, %cst_23 {dimension_numbers = #tpu.dot_dimension_numbers<[1], [0], [0], [1], [0, 0, 1, 1], [], []>} : vector<4x64xf32>, vector<64x256xf32>, vector<4x256xf32> -> vector<4x256xf32>
    %c1_24 = arith.constant 1 : index
    %c0_25 = arith.constant 0 : index
    %c0_26 = arith.constant 0 : index
    %17 = vector.load %arg1[%c1_24, %c0_25, %c0_26] : memref<2x4x256xf32, #tpu.memory_space<vmem>>, vector<1x4x256xf32>
    %18 = vector.shape_cast %17 : vector<1x4x256xf32> to vector<4x256xf32>
    %19 = tpu.concatenate %18, %16 in 0 : vector<4x256xf32>, vector<4x256xf32> -> vector<8x256xf32>
    %20 = tpu.concatenate %13, %19 in 1 : vector<8x256xf32>, vector<8x256xf32> -> vector<8x512xf32>
    %c17_i32 = arith.constant 17 : i32
    %21 = tpu.dynamic_rotate %20 by %c17_i32 dim 1 : vector<8x512xf32>, i32 -> vector<8x512xf32>
    %22 = vector.extract_strided_slice %0 {offsets = [0, 0], sizes = [1, 512], strides = [1, 1]} : vector<9x512xf32> to vector<1x512xf32>
    %23 = vector.broadcast %22 : vector<1x512xf32> to vector<8x512xf32>
    %24 = arith.mulf %21, %23 : vector<8x512xf32>
    %c16_i32 = arith.constant 16 : i32
    %25 = tpu.dynamic_rotate %20 by %c16_i32 dim 1 : vector<8x512xf32>, i32 -> vector<8x512xf32>
    %26 = vector.extract_strided_slice %0 {offsets = [1, 0], sizes = [1, 512], strides = [1, 1]} : vector<9x512xf32> to vector<1x512xf32>
    %27 = vector.broadcast %26 : vector<1x512xf32> to vector<8x512xf32>
    %28 = arith.mulf %25, %27 : vector<8x512xf32>
    %c15_i32 = arith.constant 15 : i32
    %29 = tpu.dynamic_rotate %20 by %c15_i32 dim 1 : vector<8x512xf32>, i32 -> vector<8x512xf32>
    %30 = vector.extract_strided_slice %0 {offsets = [2, 0], sizes = [1, 512], strides = [1, 1]} : vector<9x512xf32> to vector<1x512xf32>
    %31 = vector.broadcast %30 : vector<1x512xf32> to vector<8x512xf32>
    %32 = arith.mulf %29, %31 : vector<8x512xf32>
    %c1_i32 = arith.constant 1 : i32
    %33 = tpu.dynamic_rotate %20 by %c1_i32 dim 1 : vector<8x512xf32>, i32 -> vector<8x512xf32>
    %34 = vector.extract_strided_slice %0 {offsets = [3, 0], sizes = [1, 512], strides = [1, 1]} : vector<9x512xf32> to vector<1x512xf32>
    %35 = vector.broadcast %34 : vector<1x512xf32> to vector<8x512xf32>
    %36 = arith.mulf %33, %35 : vector<8x512xf32>
    %c511_i32 = arith.constant 511 : i32
    %37 = tpu.dynamic_rotate %20 by %c511_i32 dim 1 : vector<8x512xf32>, i32 -> vector<8x512xf32>
    %38 = vector.extract_strided_slice %0 {offsets = [5, 0], sizes = [1, 512], strides = [1, 1]} : vector<9x512xf32> to vector<1x512xf32>
    %39 = vector.broadcast %38 : vector<1x512xf32> to vector<8x512xf32>
    %40 = arith.mulf %37, %39 : vector<8x512xf32>
    %c497_i32 = arith.constant 497 : i32
    %41 = tpu.dynamic_rotate %20 by %c497_i32 dim 1 : vector<8x512xf32>, i32 -> vector<8x512xf32>
    %42 = vector.extract_strided_slice %0 {offsets = [6, 0], sizes = [1, 512], strides = [1, 1]} : vector<9x512xf32> to vector<1x512xf32>
    %43 = vector.broadcast %42 : vector<1x512xf32> to vector<8x512xf32>
    %44 = arith.mulf %41, %43 : vector<8x512xf32>
    %c496_i32 = arith.constant 496 : i32
    %45 = tpu.dynamic_rotate %20 by %c496_i32 dim 1 : vector<8x512xf32>, i32 -> vector<8x512xf32>
    %46 = vector.extract_strided_slice %0 {offsets = [7, 0], sizes = [1, 512], strides = [1, 1]} : vector<9x512xf32> to vector<1x512xf32>
    %47 = vector.broadcast %46 : vector<1x512xf32> to vector<8x512xf32>
    %48 = arith.mulf %45, %47 : vector<8x512xf32>
    %c495_i32 = arith.constant 495 : i32
    %49 = tpu.dynamic_rotate %20 by %c495_i32 dim 1 : vector<8x512xf32>, i32 -> vector<8x512xf32>
    %50 = vector.extract_strided_slice %0 {offsets = [8, 0], sizes = [1, 512], strides = [1, 1]} : vector<9x512xf32> to vector<1x512xf32>
    %51 = vector.broadcast %50 : vector<1x512xf32> to vector<8x512xf32>
    %52 = arith.mulf %49, %51 : vector<8x512xf32>
    %53 = tpu.concatenate %24, %28, %32, %36, %20, %40, %44, %48, %52 in 0 : vector<8x512xf32>, vector<8x512xf32>, vector<8x512xf32>, vector<8x512xf32>, vector<8x512xf32>, vector<8x512xf32>, vector<8x512xf32>, vector<8x512xf32>, vector<8x512xf32> -> vector<72x512xf32>
    %cst_27 = arith.constant dense<0.000000e+00> : vector<8x512xf32>
    %54 = tpu.matmul %2, %53, %cst_27 {dimension_numbers = #tpu.dot_dimension_numbers<[1], [0], [0], [1], [0, 0, 1, 1], [], []>} : vector<8x72xf32>, vector<72x512xf32>, vector<8x512xf32> -> vector<8x512xf32>
    %55 = vector.extract_strided_slice %54 {offsets = [0, 0], sizes = [8, 256], strides = [1, 1]} : vector<8x512xf32> to vector<8x256xf32>
    %cst_28 = arith.constant dense<0.000000e+00> : vector<8xf32>
    %56 = vector.multi_reduction <add>, %55, %cst_28 [1] : vector<8x256xf32> to vector<8xf32>
    %57 = vector.shape_cast %56 : vector<8xf32> to vector<8x1xf32>
    %58 = arith.mulf %55, %55 : vector<8x256xf32>
    %cst_29 = arith.constant dense<0.000000e+00> : vector<8xf32>
    %59 = vector.multi_reduction <add>, %58, %cst_29 [1] : vector<8x256xf32> to vector<8xf32>
    %60 = vector.shape_cast %59 : vector<8xf32> to vector<8x1xf32>
    %cst_30 = arith.constant 3.906250e-03 : f32
    %61 = vector.broadcast %cst_30 : f32 to vector<8x1xf32>
    %62 = arith.mulf %57, %61 : vector<8x1xf32>
    %cst_31 = arith.constant 3.906250e-03 : f32
    %63 = vector.broadcast %cst_31 : f32 to vector<8x1xf32>
    %64 = arith.mulf %60, %63 : vector<8x1xf32>
    %65 = arith.mulf %62, %62 : vector<8x1xf32>
    %66 = arith.subf %64, %65 : vector<8x1xf32>
    %cst_32 = arith.constant 0.000000e+00 : f32
    %67 = vector.broadcast %cst_32 : f32 to vector<8x1xf32>
    %68 = arith.maximumf %66, %67 : vector<8x1xf32>
    %cst_33 = arith.constant 9.99999974E-6 : f32
    %69 = vector.broadcast %cst_33 : f32 to vector<8x1xf32>
    %70 = arith.addf %68, %69 : vector<8x1xf32>
    %71 = math.rsqrt %70 : vector<8x1xf32>
    %72 = arith.mulf %4, %71 : vector<8x1xf32>
    %73 = arith.mulf %62, %72 : vector<8x1xf32>
    %74 = arith.subf %5, %73 : vector<8x1xf32>
    %75 = vector.broadcast %72 : vector<8x1xf32> to vector<8x256xf32>
    %76 = arith.mulf %55, %75 : vector<8x256xf32>
    %77 = vector.broadcast %74 : vector<8x1xf32> to vector<8x256xf32>
    %78 = arith.addf %76, %77 : vector<8x256xf32>
    %cst_34 = arith.constant 0.000000e+00 : f32
    %79 = vector.broadcast %cst_34 : f32 to vector<8x256xf32>
    %80 = arith.maximumf %78, %79 : vector<8x256xf32>
    %81 = vector.extract_strided_slice %54 {offsets = [0, 256], sizes = [8, 256], strides = [1, 1]} : vector<8x512xf32> to vector<8x256xf32>
    %cst_35 = arith.constant dense<0.000000e+00> : vector<8xf32>
    %82 = vector.multi_reduction <add>, %81, %cst_35 [1] : vector<8x256xf32> to vector<8xf32>
    %83 = vector.shape_cast %82 : vector<8xf32> to vector<8x1xf32>
    %84 = arith.mulf %81, %81 : vector<8x256xf32>
    %cst_36 = arith.constant dense<0.000000e+00> : vector<8xf32>
    %85 = vector.multi_reduction <add>, %84, %cst_36 [1] : vector<8x256xf32> to vector<8xf32>
    %86 = vector.shape_cast %85 : vector<8xf32> to vector<8x1xf32>
    %cst_37 = arith.constant 3.906250e-03 : f32
    %87 = vector.broadcast %cst_37 : f32 to vector<8x1xf32>
    %88 = arith.mulf %83, %87 : vector<8x1xf32>
    %cst_38 = arith.constant 3.906250e-03 : f32
    %89 = vector.broadcast %cst_38 : f32 to vector<8x1xf32>
    %90 = arith.mulf %86, %89 : vector<8x1xf32>
    %91 = arith.mulf %88, %88 : vector<8x1xf32>
    %92 = arith.subf %90, %91 : vector<8x1xf32>
    %cst_39 = arith.constant 0.000000e+00 : f32
    %93 = vector.broadcast %cst_39 : f32 to vector<8x1xf32>
    %94 = arith.maximumf %92, %93 : vector<8x1xf32>
    %cst_40 = arith.constant 9.99999974E-6 : f32
    %95 = vector.broadcast %cst_40 : f32 to vector<8x1xf32>
    %96 = arith.addf %94, %95 : vector<8x1xf32>
    %97 = math.rsqrt %96 : vector<8x1xf32>
    %98 = arith.mulf %4, %97 : vector<8x1xf32>
    %99 = arith.mulf %88, %98 : vector<8x1xf32>
    %100 = arith.subf %5, %99 : vector<8x1xf32>
    %101 = vector.broadcast %98 : vector<8x1xf32> to vector<8x256xf32>
    %102 = arith.mulf %81, %101 : vector<8x256xf32>
    %103 = vector.broadcast %100 : vector<8x1xf32> to vector<8x256xf32>
    %104 = arith.addf %102, %103 : vector<8x256xf32>
    %cst_41 = arith.constant 0.000000e+00 : f32
    %105 = vector.broadcast %cst_41 : f32 to vector<8x256xf32>
    %106 = arith.maximumf %104, %105 : vector<8x256xf32>
    %107 = tpu.concatenate %80, %106 in 1 : vector<8x256xf32>, vector<8x256xf32> -> vector<8x512xf32>
    %c17_i32_42 = arith.constant 17 : i32
    %108 = tpu.dynamic_rotate %107 by %c17_i32_42 dim 1 : vector<8x512xf32>, i32 -> vector<8x512xf32>
    %109 = vector.extract_strided_slice %0 {offsets = [0, 0], sizes = [1, 512], strides = [1, 1]} : vector<9x512xf32> to vector<1x512xf32>
    %110 = vector.broadcast %109 : vector<1x512xf32> to vector<8x512xf32>
    %111 = arith.mulf %108, %110 : vector<8x512xf32>
    %c16_i32_43 = arith.constant 16 : i32
    %112 = tpu.dynamic_rotate %107 by %c16_i32_43 dim 1 : vector<8x512xf32>, i32 -> vector<8x512xf32>
    %113 = vector.extract_strided_slice %0 {offsets = [1, 0], sizes = [1, 512], strides = [1, 1]} : vector<9x512xf32> to vector<1x512xf32>
    %114 = vector.broadcast %113 : vector<1x512xf32> to vector<8x512xf32>
    %115 = arith.mulf %112, %114 : vector<8x512xf32>
    %c15_i32_44 = arith.constant 15 : i32
    %116 = tpu.dynamic_rotate %107 by %c15_i32_44 dim 1 : vector<8x512xf32>, i32 -> vector<8x512xf32>
    %117 = vector.extract_strided_slice %0 {offsets = [2, 0], sizes = [1, 512], strides = [1, 1]} : vector<9x512xf32> to vector<1x512xf32>
    %118 = vector.broadcast %117 : vector<1x512xf32> to vector<8x512xf32>
    %119 = arith.mulf %116, %118 : vector<8x512xf32>
    %c1_i32_45 = arith.constant 1 : i32
    %120 = tpu.dynamic_rotate %107 by %c1_i32_45 dim 1 : vector<8x512xf32>, i32 -> vector<8x512xf32>
    %121 = vector.extract_strided_slice %0 {offsets = [3, 0], sizes = [1, 512], strides = [1, 1]} : vector<9x512xf32> to vector<1x512xf32>
    %122 = vector.broadcast %121 : vector<1x512xf32> to vector<8x512xf32>
    %123 = arith.mulf %120, %122 : vector<8x512xf32>
    %c511_i32_46 = arith.constant 511 : i32
    %124 = tpu.dynamic_rotate %107 by %c511_i32_46 dim 1 : vector<8x512xf32>, i32 -> vector<8x512xf32>
    %125 = vector.extract_strided_slice %0 {offsets = [5, 0], sizes = [1, 512], strides = [1, 1]} : vector<9x512xf32> to vector<1x512xf32>
    %126 = vector.broadcast %125 : vector<1x512xf32> to vector<8x512xf32>
    %127 = arith.mulf %124, %126 : vector<8x512xf32>
    %c497_i32_47 = arith.constant 497 : i32
    %128 = tpu.dynamic_rotate %107 by %c497_i32_47 dim 1 : vector<8x512xf32>, i32 -> vector<8x512xf32>
    %129 = vector.extract_strided_slice %0 {offsets = [6, 0], sizes = [1, 512], strides = [1, 1]} : vector<9x512xf32> to vector<1x512xf32>
    %130 = vector.broadcast %129 : vector<1x512xf32> to vector<8x512xf32>
    %131 = arith.mulf %128, %130 : vector<8x512xf32>
    %c496_i32_48 = arith.constant 496 : i32
    %132 = tpu.dynamic_rotate %107 by %c496_i32_48 dim 1 : vector<8x512xf32>, i32 -> vector<8x512xf32>
    %133 = vector.extract_strided_slice %0 {offsets = [7, 0], sizes = [1, 512], strides = [1, 1]} : vector<9x512xf32> to vector<1x512xf32>
    %134 = vector.broadcast %133 : vector<1x512xf32> to vector<8x512xf32>
    %135 = arith.mulf %132, %134 : vector<8x512xf32>
    %c495_i32_49 = arith.constant 495 : i32
    %136 = tpu.dynamic_rotate %107 by %c495_i32_49 dim 1 : vector<8x512xf32>, i32 -> vector<8x512xf32>
    %137 = vector.extract_strided_slice %0 {offsets = [8, 0], sizes = [1, 512], strides = [1, 1]} : vector<9x512xf32> to vector<1x512xf32>
    %138 = vector.broadcast %137 : vector<1x512xf32> to vector<8x512xf32>
    %139 = arith.mulf %136, %138 : vector<8x512xf32>
    %140 = tpu.concatenate %111, %115, %119, %123, %107, %127, %131, %135, %139 in 0 : vector<8x512xf32>, vector<8x512xf32>, vector<8x512xf32>, vector<8x512xf32>, vector<8x512xf32>, vector<8x512xf32>, vector<8x512xf32>, vector<8x512xf32>, vector<8x512xf32> -> vector<72x512xf32>
    %cst_50 = arith.constant dense<0.000000e+00> : vector<8x512xf32>
    %141 = tpu.matmul %3, %140, %cst_50 {dimension_numbers = #tpu.dot_dimension_numbers<[1], [0], [0], [1], [0, 0, 1, 1], [], []>} : vector<8x72xf32>, vector<72x512xf32>, vector<8x512xf32> -> vector<8x512xf32>
    %142 = vector.extract_strided_slice %141 {offsets = [0, 0], sizes = [8, 256], strides = [1, 1]} : vector<8x512xf32> to vector<8x256xf32>
    %cst_51 = arith.constant dense<0.000000e+00> : vector<8xf32>
    %143 = vector.multi_reduction <add>, %142, %cst_51 [1] : vector<8x256xf32> to vector<8xf32>
    %144 = vector.shape_cast %143 : vector<8xf32> to vector<8x1xf32>
    %145 = arith.mulf %142, %142 : vector<8x256xf32>
    %cst_52 = arith.constant dense<0.000000e+00> : vector<8xf32>
    %146 = vector.multi_reduction <add>, %145, %cst_52 [1] : vector<8x256xf32> to vector<8xf32>
    %147 = vector.shape_cast %146 : vector<8xf32> to vector<8x1xf32>
    %cst_53 = arith.constant 3.906250e-03 : f32
    %148 = vector.broadcast %cst_53 : f32 to vector<8x1xf32>
    %149 = arith.mulf %144, %148 : vector<8x1xf32>
    %cst_54 = arith.constant 3.906250e-03 : f32
    %150 = vector.broadcast %cst_54 : f32 to vector<8x1xf32>
    %151 = arith.mulf %147, %150 : vector<8x1xf32>
    %152 = arith.mulf %149, %149 : vector<8x1xf32>
    %153 = arith.subf %151, %152 : vector<8x1xf32>
    %cst_55 = arith.constant 0.000000e+00 : f32
    %154 = vector.broadcast %cst_55 : f32 to vector<8x1xf32>
    %155 = arith.maximumf %153, %154 : vector<8x1xf32>
    %cst_56 = arith.constant 9.99999974E-6 : f32
    %156 = vector.broadcast %cst_56 : f32 to vector<8x1xf32>
    %157 = arith.addf %155, %156 : vector<8x1xf32>
    %158 = math.rsqrt %157 : vector<8x1xf32>
    %159 = arith.mulf %6, %158 : vector<8x1xf32>
    %160 = arith.mulf %149, %159 : vector<8x1xf32>
    %161 = arith.subf %7, %160 : vector<8x1xf32>
    %162 = vector.broadcast %159 : vector<8x1xf32> to vector<8x256xf32>
    %163 = arith.mulf %142, %162 : vector<8x256xf32>
    %164 = vector.broadcast %161 : vector<8x1xf32> to vector<8x256xf32>
    %165 = arith.addf %163, %164 : vector<8x256xf32>
    %cst_57 = arith.constant 0.000000e+00 : f32
    %166 = vector.broadcast %cst_57 : f32 to vector<8x256xf32>
    %167 = arith.maximumf %165, %166 : vector<8x256xf32>
    %c0_58 = arith.constant 0 : index
    %c0_59 = arith.constant 0 : index
    %c0_60 = arith.constant 0 : index
    %168 = vector.load %arg11[%c0_58, %c0_59, %c0_60] : memref<2x8x256xf32, #tpu.memory_space<vmem>>, vector<1x8x256xf32>
    %169 = vector.shape_cast %168 : vector<1x8x256xf32> to vector<8x256xf32>
    %170 = vector.shape_cast %167 : vector<8x256xf32> to vector<1x8x256xf32>
    tpu.vector_store %arg11[%c0_58, %c0_59, %c0_60], %170 {strides = array<i32>} : memref<2x8x256xf32, #tpu.memory_space<vmem>>, vector<1x8x256xf32>,
    %171 = vector.extract_strided_slice %141 {offsets = [0, 256], sizes = [8, 256], strides = [1, 1]} : vector<8x512xf32> to vector<8x256xf32>
    %cst_61 = arith.constant dense<0.000000e+00> : vector<8xf32>
    %172 = vector.multi_reduction <add>, %171, %cst_61 [1] : vector<8x256xf32> to vector<8xf32>
    %173 = vector.shape_cast %172 : vector<8xf32> to vector<8x1xf32>
    %174 = arith.mulf %171, %171 : vector<8x256xf32>
    %cst_62 = arith.constant dense<0.000000e+00> : vector<8xf32>
    %175 = vector.multi_reduction <add>, %174, %cst_62 [1] : vector<8x256xf32> to vector<8xf32>
    %176 = vector.shape_cast %175 : vector<8xf32> to vector<8x1xf32>
    %cst_63 = arith.constant 3.906250e-03 : f32
    %177 = vector.broadcast %cst_63 : f32 to vector<8x1xf32>
    %178 = arith.mulf %173, %177 : vector<8x1xf32>
    %cst_64 = arith.constant 3.906250e-03 : f32
    %179 = vector.broadcast %cst_64 : f32 to vector<8x1xf32>
    %180 = arith.mulf %176, %179 : vector<8x1xf32>
    %181 = arith.mulf %178, %178 : vector<8x1xf32>
    %182 = arith.subf %180, %181 : vector<8x1xf32>
    %cst_65 = arith.constant 0.000000e+00 : f32
    %183 = vector.broadcast %cst_65 : f32 to vector<8x1xf32>
    %184 = arith.maximumf %182, %183 : vector<8x1xf32>
    %cst_66 = arith.constant 9.99999974E-6 : f32
    %185 = vector.broadcast %cst_66 : f32 to vector<8x1xf32>
    %186 = arith.addf %184, %185 : vector<8x1xf32>
    %187 = math.rsqrt %186 : vector<8x1xf32>
    %188 = arith.mulf %6, %187 : vector<8x1xf32>
    %189 = arith.mulf %178, %188 : vector<8x1xf32>
    %190 = arith.subf %7, %189 : vector<8x1xf32>
    %191 = vector.broadcast %188 : vector<8x1xf32> to vector<8x256xf32>
    %192 = arith.mulf %171, %191 : vector<8x256xf32>
    %193 = vector.broadcast %190 : vector<8x1xf32> to vector<8x256xf32>
    %194 = arith.addf %192, %193 : vector<8x256xf32>
    %cst_67 = arith.constant 0.000000e+00 : f32
    %195 = vector.broadcast %cst_67 : f32 to vector<8x256xf32>
    %196 = arith.maximumf %194, %195 : vector<8x256xf32>
    %c1_68 = arith.constant 1 : index
    %c0_69 = arith.constant 0 : index
    %c0_70 = arith.constant 0 : index
    %197 = vector.load %arg11[%c1_68, %c0_69, %c0_70] : memref<2x8x256xf32, #tpu.memory_space<vmem>>, vector<1x8x256xf32>
    %198 = vector.shape_cast %197 : vector<1x8x256xf32> to vector<8x256xf32>
    %199 = vector.shape_cast %196 : vector<8x256xf32> to vector<1x8x256xf32>
    tpu.vector_store %arg11[%c1_68, %c0_69, %c0_70], %199 {strides = array<i32>} : memref<2x8x256xf32, #tpu.memory_space<vmem>>, vector<1x8x256xf32>,
    return
  }
  func.func @transform_0(%arg0: i32) -> (i32, i32, i32) {
    %c0_i32 = arith.constant 0 : i32
    %c0_i32_0 = arith.constant 0 : i32
    %c0_i32_1 = arith.constant 0 : i32
    return %arg0, %c0_i32, %c0_i32_0 : i32, i32, i32
  }
  func.func @transform_1(%arg0: i32) -> (i32, i32, i32) {
    %c0_i32 = arith.constant 0 : i32
    %c0_i32_0 = arith.constant 0 : i32
    %c0_i32_1 = arith.constant 0 : i32
    return %arg0, %c0_i32, %c0_i32_0 : i32, i32, i32
  }
  func.func @transform_2(%arg0: i32) -> (i32, i32) {
    %c0_i32 = arith.constant 0 : i32
    %c0_i32_0 = arith.constant 0 : i32
    %c0_i32_1 = arith.constant 0 : i32
    return %c0_i32, %c0_i32_0 : i32, i32
  }
  func.func @transform_3(%arg0: i32) -> (i32, i32) {
    %c0_i32 = arith.constant 0 : i32
    %c0_i32_0 = arith.constant 0 : i32
    %c0_i32_1 = arith.constant 0 : i32
    return %c0_i32, %c0_i32_0 : i32, i32
  }
  func.func @transform_4(%arg0: i32) -> (i32, i32) {
    %c0_i32 = arith.constant 0 : i32
    %c0_i32_0 = arith.constant 0 : i32
    %c0_i32_1 = arith.constant 0 : i32
    return %c0_i32, %c0_i32_0 : i32, i32
  }
  func.func @transform_5(%arg0: i32) -> (i32, i32) {
    %c0_i32 = arith.constant 0 : i32
    %c0_i32_0 = arith.constant 0 : i32
    %c0_i32_1 = arith.constant 0 : i32
    return %c0_i32, %c0_i32_0 : i32, i32
  }
  func.func @transform_6(%arg0: i32) -> (i32, i32) {
    %c0_i32 = arith.constant 0 : i32
    %c0_i32_0 = arith.constant 0 : i32
    %c0_i32_1 = arith.constant 0 : i32
    return %c0_i32, %c0_i32_0 : i32, i32
  }
  func.func @transform_7(%arg0: i32) -> (i32, i32) {
    %c0_i32 = arith.constant 0 : i32
    %c0_i32_0 = arith.constant 0 : i32
    %c0_i32_1 = arith.constant 0 : i32
    return %c0_i32, %c0_i32_0 : i32, i32
  }
  func.func @transform_8(%arg0: i32) -> (i32, i32) {
    %c0_i32 = arith.constant 0 : i32
    %c0_i32_0 = arith.constant 0 : i32
    %c0_i32_1 = arith.constant 0 : i32
    return %c0_i32, %c0_i32_0 : i32, i32
  }
  func.func @transform_9(%arg0: i32) -> (i32, i32) {
    %c0_i32 = arith.constant 0 : i32
    %c0_i32_0 = arith.constant 0 : i32
    %c0_i32_1 = arith.constant 0 : i32
    return %c0_i32, %c0_i32_0 : i32, i32
  }
  func.func @transform_10(%arg0: i32) -> (i32, i32, i32) {
    %c0_i32 = arith.constant 0 : i32
    %c0_i32_0 = arith.constant 0 : i32
    %c0_i32_1 = arith.constant 0 : i32
    return %arg0, %c0_i32, %c0_i32_0 : i32, i32, i32
  }
}

</mosaic_0001>

<bundles_post_ra>
// kernel: up_forward.1
= control target key start
LH: loop header
LB: loop body
LE: loop exit
PB: predicated region body
PF: predicated region fallthrough
CT: control target
= control target key end

     0   :  { %s1724_s13 = smov 0   ;;  %s2375_s0 = inlined_call_operand.vmem [shape: f32[4,4,256], index: 0, kind: input, shape index: {}]   ;;  %s2376_s1 = inlined_call_operand.vmem [shape: f32[4,4,64], index: 1, kind: input, shape index: {}]   ;;  %s2377_s2 = inlined_call_operand.vmem [shape: f32[64,256], index: 2, kind: input, shape index: {}]   ;;  %s2378_s3 = inlined_call_operand.vmem [shape: f32[9,512], index: 3, kind: input, shape index: {}]   ;;  %s2379_s4 = inlined_call_operand.vmem [shape: f32[8,72], index: 4, kind: input, shape index: {}]   ;;  %s2380_s5 = inlined_call_operand.vmem [shape: f32[8,1], index: 5, kind: input, shape index: {}]   ;;  %s2381_s6 = inlined_call_operand.vmem [shape: f32[8,1], index: 6, kind: input, shape index: {}]   ;;  %s2382_s7 = inlined_call_operand.vmem [shape: f32[8,72], index: 7, kind: input, shape index: {}]   ;;  %s2383_s8 = inlined_call_operand.vmem [shape: f32[8,1], index: 8, kind: input, shape index: {}]   ;;  %s2384_s9 = inlined_call_operand.vmem [shape: f32[8,1], index: 9, kind: input, shape index: {}]   ;;  %s2385_s10 = inlined_call_operand.vmem [shape: f32[4,8,256], index: 10, kind: output, shape index: {}]  }
   0x1 LB: > { %s1494_s14 = sadd.s32 4294967295, %s1657_s13   ;;  %p1498_p0 = scmp.ge.s32.totalorder %s1657_s13, 1  ;;  %s1657_s13 = sphi %s1724_s13, %s20_s13  }
   0x2   : > { %p325_p1 = scmp.lt.s32.totalorder %s1657_s13, 3 }
   0x4   : > { %p326_p2 = pnand %p1498_p0, %p325_p1 }
   0x6   : > { %329 = sbr.rel (%p326_p2) target bundleno = 1655 (0x677), region = 60 }
   0xd   : > { %v399_v0 = vld [vmem:[%s2377_s2 + $0x8] sm:$0xff]  ;;  %v401_v1 = vld [vmem:[%s2377_s2 + $0x18] sm:$0xff]  ;;  %v398_v2 = vld [vmem:[%s2377_s2] sm:$0xff]  ;;  %s1499_s21 = sshll.u32 %s1494_s14, 1  ;;  %v2386_v7 = vmov 0.0   ;;  %vm421_vm0 = vcmask 523264   ;;  %v606_v51 = vlaneseq }
   0xe   : > { %v1525_v3 = vpack.c.bf16 %v401_v1, %v399_v0  ;;  %v400_v4 = vld [vmem:[%s2377_s2 + $0x10] sm:$0xff]  ;;  %v403_v5 = vld [vmem:[%s2377_s2 + $0x28] sm:$0xff]  ;;  %v405_v6 = vld [vmem:[%s2377_s2 + $0x38] sm:$0xff]  ;;  %489 = vmatprep.mubr.f32.mxu0 %v2386_v7  ;;  %578 = vmatprep.mubr.f32.mxu1 %v2386_v7  ;;  %p371_p3 = scmp.lt.s32.totalorder %s1499_s21, 3  ;;  %vm506_vm1 = vcmask 1043456   ;;  %s1660_s19 = smov 16  }
   0xf   : > { %v1527_v8 = vpack.c.bf16 %v400_v4, %v398_v2  ;;  %v1529_v9 = vpack.c.bf16 %v405_v6, %v403_v5  ;;  %v402_v10 = vld [vmem:[%s2377_s2 + $0x20] sm:$0xff]  ;;  %v404_v11 = vld [vmem:[%s2377_s2 + $0x30] sm:$0xff]  ;;  %v407_v12 = vld [vmem:[%s2377_s2 + $0x48] sm:$0xff]  ;;  %s1661_s20 = smov 17   ;;  %s1662_s22 = smov 127   ;;  %v1887_v53 = vshrl.u32 %v606_v51, 7 }
  0x10   : > { %1526 = vmatprep.subr.bf16.mxu0 %v1525_v3  ;;  %1542 = vmatprep.subr.bf16.mxu1 %v1525_v3  ;;  %v409_v13 = vld [vmem:[%s2377_s2 + $0x58] sm:$0xff]  ;;  %v1531_v14 = vpack.c.bf16 %v404_v11, %v402_v10  ;;  %v406_v16 = vld [vmem:[%s2377_s2 + $0x40] sm:$0xff]  ;;  %v408_v17 = vld [vmem:[%s2377_s2 + $0x50] sm:$0xff]  ;;  %s2396_s21 = smov (!%p371_p3, %s1499_s21), 3  ;;  %s1663_s23 = smov 113   ;;  %v1889_v55 = vand.u32 127, %v606_v51 }
  0x11   : > { %1528 = vmatpush1.bf16.msra.mxu0 %v1527_v8  ;;  %1544 = vmatpush1.bf16.msra.mxu1 %v1527_v8  ;;  %v1533_v15 = vpack.c.bf16 %v409_v13, %v407_v12  ;;  %v411_v18 = vld [vmem:[%s2377_s2 + $0x68] sm:$0xff]  ;;  %v413_v19 = vld [vmem:[%s2377_s2 + $0x78] sm:$0xff]  ;;  %v1535_v20 = vpack.c.bf16 %v408_v17, %v406_v16  ;;  %v410_v22 = vld [vmem:[%s2377_s2 + $0x60] sm:$0xff]  ;;  %s1503_s30 = sshll.u32 %s2396_s21, 2  ;;  %s1523_s15 = sshll.u32 %s2396_s21, 3  ;;  %v615_v56 = vsub.s32 0, %v1887_v53 }
  0x12   : > { %1530 = vmatprep.subr.bf16.mxu0 %v1529_v9  ;;  %1546 = vmatprep.subr.bf16.mxu1 %v1529_v9  ;;  %v1537_v21 = vpack.c.bf16 %v413_v19, %v411_v18  ;;  %v412_v23 = vld [vmem:[%s2377_s2 + $0x70] sm:$0xff]  ;;  %s381_s14 = scalar_lea.vmem %s2376_s1, %s1503_s30  ;;  %s375_s18 = scalar_lea.vmem %s2375_s0, %s1523_s15  ;;  %v1895_v57 = vld [vmem:[%s2378_s3 + $0x18] sm:$0xff]  ;;  %v648_v58 = vsub.s32 1, %v1887_v53  ;;  %vm608_vm2 = vcmp.lt.s32.totalorder %v1889_v55, 17  ;;  %vm641_vm3 = vcmp.lt.s32.totalorder %v1889_v55, 16  ;;  %v1920_v5 = vld [vmem:[%s2378_s3 + $0x8] sm:$0xff] }
  0x13   : > { %v1539_v24 = vpack.c.bf16 %v412_v23, %v410_v22  ;;  %v420_v25 = vld [vmem:[%s381_s14] sm:$0xf]  ;;  %v1508_v26 = vld [vmem:[%s381_s14 + $0x4] sm:$0xf]  ;;  %v1510_v35 = vld [vmem:[%s375_s18 + $0x8] sm:$0xff]  ;;  %s1664_s24 = smov 112   ;;  %v1902_v61 = vrot.slane %v1895_v57, %v615_v56 }
  0x14   : > { %v496_v28 = vld [vmem:[%s375_s18] sm:$0xff]  ;;  %s1665_s25 = smov 15   ;;  %v588_v40 = vcombine.high %v1510_v35, %v1510_v35  ;;  %s1666_s26 = smov 1   ;;  %v1905_v62 = vrot.slane %v1895_v57, %v648_v58  ;;  %v1925_v6 = vld [vmem:[%s2378_s3 + $0x10] sm:$0xff]  ;;  %v681_v10 = vsub.s32 2, %v1887_v53  ;;  %v714_v13 = vsub.s32 3, %v1887_v53 }
  0x15   : > { %1532 = vmatpush1.bf16.msra.mxu0 %v1531_v14  ;;  %1548 = vmatpush1.bf16.msra.mxu1 %v1531_v14  ;;  %v498_v37 = vcombine.high %v496_v28, %v496_v28  ;;  %s1667_s27 = smov 111   ;;  %v1930_v8 = vld [vmem:[%s2378_s3] sm:$0xff]  ;;  %v1937_v14 = vrot.slane %v1920_v5, %v648_v58  ;;  %vm674_vm4 = vcmp.lt.s32.totalorder %v1889_v55, 15  ;;  %v747_v18 = vsub.s32 5, %v1887_v53 }
  0x16   : > { %1534 = vmatprep.subr.bf16.mxu0 %v1533_v15  ;;  %1550 = vmatprep.subr.bf16.mxu1 %v1533_v15  ;;  %v1940_v15 = vrot.slane %v1925_v6, %v648_v58  ;;  %v1943_v16 = vrot.slane %v1930_v8, %v615_v56  ;;  %v1946_v17 = vrot.slane %v1930_v8, %v648_v58  ;;  %vm707_vm5 = vcmp.lt.s32.totalorder %v1889_v55, 1 }
  0x17   : > { %v1951_v19 = vrot.slane %v1920_v5, %v681_v10  ;;  %v1960_v22 = vrot.slane %v1920_v5, %v714_v13  ;;  %vm740_vm6 = vcmp.lt.s32.totalorder %v1889_v55, 127  ;;  %vm773_vm7 = vcmp.lt.s32.totalorder %v1889_v55, 113 }
  0x18   : > { %vm806_vm8 = vcmp.lt.s32.totalorder %v1889_v55, 112  ;;  %vm839_vm9 = vcmp.lt.s32.totalorder %v1889_v55, 111  ;;  %vm864_vm10 = vcmask 588800  }
  0x19   : > { %1536 = vmatpush1.bf16.msra.mxu0 %v1535_v20  ;;  %1552 = vmatpush1.bf16.msra.mxu1 %v1535_v20  ;;  %v1954_v20 = vrot.slane %v1925_v6, %v681_v10 }
  0x1a   : > { %1538 = vmatprep.subr.bf16.mxu0 %v1537_v21  ;;  %1554 = vmatprep.subr.bf16.mxu1 %v1537_v21 }
  0x1d   : > { %1540 = vmatpush1.bf16.msra.mxu0 %v1539_v24  ;;  %1556 = vmatpush1.bf16.msra.mxu1 %v1539_v24 }
  0x20   : > { %1507 = vmatmul.mubr.msk.f32.vlgmr.msra.gmra.mrb[0].mxu0 %vm421_vm0, %v420_v25  ;;  %1509 = vmatmul.mubr.msk.f32.vlgmr.msra.gmra.mrb[0].mxu1 %vm421_vm0, %v1508_v26  ;;  %v1966_v25 = vrot.slane %v1925_v6, %v714_v13  ;;  %v1969_v26 = vrot.slane %v1930_v8, %v681_v10 }
  0x21   : > { %932 = vmatprep.mubr.f32.mxu0 %v2386_v7  ;;  %1003 = vmatprep.mubr.f32.mxu1 %v2386_v7 }
  0xf3   : > { %v491_v27 = vpop.f32.mrb[0].mxu0  ;;  %v580_v29 = vpop.f32.mrb[0].mxu1 }
  0xf4   : > { %v502_v30 = vrot.slane %v491_v27, 4  ;;  %v493_v31 = vpop.f32.mrb[1].mxu0  ;;  %v592_v32 = vrot.slane %v580_v29, 4  ;;  %v582_v33 = vpop.f32.mrb[1].mxu1  ;;  %v780_v27 = vsub.s32 6, %v1887_v53  ;;  %v1976_v29 = vrot.slane %v1930_v8, %v714_v13 }
  0xf5   : > { %v503_v38 = vrot.slane %v493_v31, 4  ;;  %v593_v41 = vrot.slane %v582_v33, 4  ;;  %v1982_v31 = vrot.slane %v1920_v5, %v615_v56  ;;  %v1988_v33 = vrot.slane %v1925_v6, %v615_v56 }
  0xf6   : > { %v1796_v34 = vsel %vm506_vm1, %v496_v28, %v502_v30  ;;  %v1803_v36 = vsel %vm506_vm1, %v1510_v35, %v592_v32  ;;  %v1973_v28 = vrot.slane %v1895_v57, %v681_v10  ;;  %v1979_v30 = vrot.slane %v1895_v57, %v714_v13 }
  0xf7   : > { %633 = vrot.lane.b32.xlu1 %v1796_v34, %s1660_s19  ;;  %598 = vrot.lane.b32.xlu0 %v1796_v34, %s1661_s20  ;;  %v1818_v39 = vsel %vm506_vm1, %v498_v37, %v503_v38  ;;  %v1825_v42 = vsel %vm506_vm1, %v588_v40, %v593_v41  ;;  %v1992_v35 = vrot.slane %v1925_v6, %v747_v18 }
  0xf8   : > { %2390 = vst [vmem:[#allocation2_spill] sm:$0xff] %v1973_v28  ;;  %2391 = vst [vmem:[#allocation3_spill] sm:$0xff] %v1979_v30  ;;  %v2003_v56 = vrot.slane %v1895_v57, %v747_v18 }
  0xfb   : > { %736 = vrot.lane.b32.xlu1 %v1803_v36, %s1662_s22  ;;  %602 = vrot.lane.b32.xlu0 %v1803_v36, %s1661_s20 }
  0xff   : > { %769 = vrot.lane.b32.xlu1 %v1803_v36, %s1663_s23  ;;  %637 = vrot.lane.b32.xlu0 %v1803_v36, %s1660_s19 }
 0x103   : > { %802 = vrot.lane.b32.xlu1 %v1803_v36, %s1664_s24  ;;  %666 = vrot.lane.b32.xlu0 %v1796_v34, %s1665_s25 }
 0x107   : > { %699 = vrot.lane.b32.xlu0 %v1796_v34, %s1666_s26  ;;  %635 = vrot.lane.b32.xlu1 %v1818_v39, %s1660_s19 }
 0x10b   : > { %670 = vrot.lane.b32.xlu0 %v1803_v36, %s1665_s25  ;;  %604 = vrot.lane.b32.xlu1 %v1825_v42, %s1661_s20 }
 0x10f   : > { %703 = vrot.lane.b32.xlu0 %v1803_v36, %s1666_s26  ;;  %639 = vrot.lane.b32.xlu1 %v1825_v42, %s1660_s19 }
 0x113   : > { %732 = vrot.lane.b32.xlu0 %v1796_v34, %s1662_s22  ;;  %668 = vrot.lane.b32.xlu1 %v1818_v39, %s1665_s25 }
 0x117   : > { %765 = vrot.lane.b32.xlu0 %v1796_v34, %s1663_s23  ;;  %701 = vrot.lane.b32.xlu1 %v1818_v39, %s1666_s26 }
 0x11b   : > { %798 = vrot.lane.b32.xlu0 %v1796_v34, %s1664_s24  ;;  %672 = vrot.lane.b32.xlu1 %v1825_v42, %s1665_s25 }
 0x11f   : > { %705 = vrot.lane.b32.xlu1 %v1825_v42, %s1666_s26  ;;  %600 = vrot.lane.b32.xlu0 %v1818_v39, %s1661_s20 }
 0x123   : > { %738 = vrot.lane.b32.xlu1 %v1825_v42, %s1662_s22  ;;  %734 = vrot.lane.b32.xlu0 %v1818_v39, %s1662_s22 }
 0x127   : > { %771 = vrot.lane.b32.xlu1 %v1825_v42, %s1663_s23  ;;  %767 = vrot.lane.b32.xlu0 %v1818_v39, %s1663_s23 }
 0x12b   : > { %804 = vrot.lane.b32.xlu1 %v1825_v42, %s1664_s24  ;;  %800 = vrot.lane.b32.xlu0 %v1818_v39, %s1664_s24 }
 0x12f   : > { %835 = vrot.lane.b32.xlu1 %v1803_v36, %s1667_s27  ;;  %833 = vrot.lane.b32.xlu0 %v1818_v39, %s1667_s27 }
 0x133   : > { %837 = vrot.lane.b32.xlu1 %v1825_v42, %s1667_s27  ;;  %831 = vrot.lane.b32.xlu0 %v1796_v34, %s1667_s27 }
 0x169   : > { %v1871_v43 = vpop.permute.xlu1 %633  ;;  %v1873_v44 = vpop.permute.xlu0 %598 }
 0x16d   : > { %v1875_v45 = vpop.permute.xlu1 %736  ;;  %v1877_v46 = vpop.permute.xlu0 %602 }
 0x171   : > { %v1879_v47 = vpop.permute.xlu1 %769  ;;  %v638_v48 = vpop.permute.xlu0 %637 }
 0x175   : > { %v1881_v49 = vpop.permute.xlu1 %802  ;;  %v1883_v50 = vpop.permute.xlu0 %666 }
 0x179   : > { %v1885_v52 = vpop.permute.xlu0 %699  ;;  %v636_v54 = vpop.permute.xlu1 %635 }
 0x17a   : > { %v643_v37 = vsel %vm641_vm3, %v636_v54, %v638_v48  ;;  %v644_v38 = vsel %vm641_vm3, %v1871_v43, %v636_v54 }
 0x17d   : > { %v1898_v59 = vpop.permute.xlu0 %670  ;;  %v605_v60 = vpop.permute.xlu1 %604 }
 0x17e   : > { %v609_v63 = vsel %vm608_vm2, %v1877_v46, %v605_v60  ;;  %v612_v32 = vsel %vm608_vm2, %v605_v60, %v1873_v44  ;;  %v2009_v60 = vrot.slane %v1930_v8, %v747_v18 }
 0x17f   : > { %v632_v3 = vmul.f32 %v1902_v61, %v609_v63  ;;  %v629_v54 = vmul.f32 %v1943_v16, %v612_v32  ;;  %v2020_v63 = vrot.slane %v1895_v57, %v780_v27 }
 0x181   : > { %v1911_v0 = vpop.permute.xlu0 %703  ;;  %v640_v1 = vpop.permute.xlu1 %639 }
 0x182   : > { %v642_v2 = vsel %vm641_vm3, %v638_v48, %v640_v1  ;;  %v645_v24 = vsel %vm641_vm3, %v640_v1, %v1871_v43  ;;  %v2012_v48 = vrot.slane %v1920_v5, %v747_v18  ;;  %v2015_v43 = vrot.slane %v1925_v6, %v780_v27 }
 0x183   : > { %v665_v4 = vmul.f32 %v1905_v62, %v642_v2  ;;  %v662_v40 = vmul.f32 %v1946_v17, %v645_v24  ;;  %v2023_v1 = vrot.slane %v1930_v8, %v780_v27  ;;  %v2026_v2 = vrot.slane %v1920_v5, %v780_v27 }
 0x185   : > { %v1932_v9 = vpop.permute.xlu0 %732  ;;  %v669_v11 = vpop.permute.xlu1 %668  ;;  %v1573_v12 = vpack.c.bf16 %v665_v4, %v632_v3  ;;  %v663_v3 = vmul.f32 %v1937_v14, %v644_v38  ;;  %v664_v4 = vmul.f32 %v1940_v15, %v643_v37  ;;  %v1559_v13 = vpack.c.bf16 %v662_v40, %v629_v54 }
 0x186   : > { %v677_v18 = vsel %vm674_vm4, %v1883_v50, %v669_v11 }
 0x187   : > { %1574 = vmatprep.subr.bf16.mxu1 %v1573_v12  ;;  %v813_v12 = vsub.s32 7, %v1887_v53 }
 0x189   : > { %v1956_v21 = vpop.permute.xlu0 %765  ;;  %v702_v23 = vpop.permute.xlu1 %701 }
 0x18a   : > { %v710_v58 = vsel %vm707_vm5, %v1885_v52, %v702_v23  ;;  %v709_v24 = vsel %vm707_vm5, %v702_v23, %v1911_v0 }
 0x18b   : > { %v729_v27 = vmul.f32 %v1960_v22, %v710_v58 }
 0x18d   : > { %v2000_v41 = vpop.permute.xlu0 %798  ;;  %v673_v51 = vpop.permute.xlu1 %672 }
 0x18e   : > { %v675_v10 = vsel %vm674_vm4, %v1898_v59, %v673_v51 }
 0x18f   : > { %v698_v58 = vmul.f32 %v1973_v28, %v675_v10 }
 0x191   : > { %v706_v32 = vpop.permute.xlu1 %705  ;;  %v601_v38 = vpop.permute.xlu0 %600 }
 0x192   : > { %v708_v37 = vsel %vm707_vm5, %v1911_v0, %v706_v32  ;;  %v711_v53 = vsel %vm707_vm5, %v706_v32, %v1885_v52  ;;  %v610_v40 = vsel %vm608_vm2, %v601_v38, %v1877_v46  ;;  %v611_v23 = vsel %vm608_vm2, %v1873_v44, %v601_v38 }
 0x193   : > { %v731_v54 = vmul.f32 %v1979_v30, %v708_v37  ;;  %v630_v7 = vmul.f32 %v1982_v31, %v611_v23  ;;  %v631_v0 = vmul.f32 %v1988_v33, %v610_v40  ;;  %v676_v52 = vsel %vm674_vm4, %v669_v11, %v1898_v59 }
 0x194   : > { %v696_v32 = vmul.f32 %v1951_v19, %v677_v18  ;;  %v730_v46 = vmul.f32 %v1966_v25, %v709_v24  ;;  %v678_v44 = vsel %vm674_vm4, %v673_v51, %v1883_v50  ;;  %v728_v10 = vmul.f32 %v1976_v29, %v711_v53 }
 0x195   : > { %v1575_v38 = vpack.c.bf16 %v664_v4, %v631_v0  ;;  %v739_v37 = vpop.permute.xlu1 %738  ;;  %v735_v30 = vpop.permute.xlu0 %734  ;;  %v1557_v23 = vpack.c.bf16 %v663_v3, %v630_v7  ;;  %v1577_v28 = vpack.c.bf16 %v731_v54, %v698_v58  ;;  %v697_v51 = vmul.f32 %v1954_v20, %v676_v52 }
 0x196   : > { %v741_v40 = vsel %vm740_vm6, %v1875_v45, %v739_v37  ;;  %v744_v59 = vsel %vm740_vm6, %v739_v37, %v1932_v9  ;;  %v742_v11 = vsel %vm740_vm6, %v735_v30, %v1875_v45  ;;  %v743_v50 = vsel %vm740_vm6, %v1932_v9, %v735_v30 }
 0x197   : > { %v695_v7 = vmul.f32 %v1969_v26, %v678_v44  ;;  %v764_v3 = vmul.f32 %v2003_v56, %v744_v59  ;;  %1558 = vmatprep.subr.bf16.mxu0 %v1557_v23  ;;  %v1561_v4 = vpack.c.bf16 %v729_v27, %v696_v32  ;;  %v763_v18 = vmul.f32 %v1992_v35, %v741_v40 }
 0x198   : > { %v761_v24 = vmul.f32 %v2009_v60, %v743_v50  ;;  %v762_v53 = vmul.f32 %v2012_v48, %v742_v11  ;;  %1576 = vmatpush1.bf16.msra.mxu1 %v1575_v38  ;;  %1560 = vmatpush1.bf16.msra.mxu0 %v1559_v13  ;;  %v1579_v45 = vpack.c.bf16 %v730_v46, %v697_v51  ;;  %v2137_v11 = vld [vmem:[%s2378_s3 + $0x28] ss:$0 sm:$0xff] }
 0x199   : > { %v1563_v58 = vpack.c.bf16 %v728_v10, %v695_v7  ;;  %1578 = vmatprep.subr.bf16.mxu1 %v1577_v28  ;;  %v772_v9 = vpop.permute.xlu1 %771  ;;  %1562 = vmatprep.subr.bf16.mxu0 %v1561_v4  ;;  %v768_v30 = vpop.permute.xlu0 %767  ;;  %v1581_v54 = vpack.c.bf16 %v764_v3, %v1825_v42  ;;  %v2099_v42 = vrot.slane %v1925_v6, %v813_v12 }
 0x19a   : > { %v774_v27 = vsel %vm773_vm7, %v1879_v47, %v772_v9  ;;  %v777_v0 = vsel %vm773_vm7, %v772_v9, %v1956_v21  ;;  %v775_v13 = vsel %vm773_vm7, %v768_v30, %v1879_v47  ;;  %v776_v28 = vsel %vm773_vm7, %v1956_v21, %v768_v30 }
 0x19b   : > { %v2102_v52 = vrot.slane %v1895_v57, %v813_v12  ;;  %v2105_v32 = vrot.slane %v1930_v8, %v813_v12  ;;  %v2108_v46 = vrot.slane %v1920_v5, %v813_v12  ;;  %v1583_v44 = vpack.c.bf16 %v763_v18, %v1803_v36 }
 0x19c   : > { %v1567_v47 = vpack.c.bf16 %v761_v24, %v1796_v34  ;;  %1580 = vmatpush1.bf16.msra.mxu1 %v1579_v45  ;;  %1564 = vmatpush1.bf16.msra.mxu0 %v1563_v58  ;;  %v1565_v21 = vpack.c.bf16 %v762_v53, %v1818_v39  ;;  %v796_v6 = vmul.f32 %v2015_v43, %v774_v27  ;;  %v2145_v24 = vld [vmem:[%s2378_s3 + $0x30] ss:$0 sm:$0xff]  ;;  %v2150_v53 = vld [vmem:[%s2378_s3 + $0x20] ss:$0 sm:$0xff]  ;;  %v2155_v45 = vld [vmem:[%s2378_s3 + $0x38] ss:$0 sm:$0xff] }
 0x19d   : > { %v797_v57 = vmul.f32 %v2020_v63, %v777_v0  ;;  %v794_v8 = vmul.f32 %v2023_v1, %v776_v28  ;;  %v795_v10 = vmul.f32 %v2026_v2, %v775_v13  ;;  %1582 = vmatprep.subr.bf16.mxu1 %v1581_v54  ;;  %v805_v5 = vpop.permute.xlu1 %804  ;;  %v801_v12 = vpop.permute.xlu0 %800 }
 0x19e   : > { %v807_v34 = vsel %vm806_vm8, %v1881_v49, %v805_v5  ;;  %v810_v36 = vsel %vm806_vm8, %v805_v5, %v2000_v41  ;;  %1566 = vmatprep.subr.bf16.mxu0 %v1565_v21  ;;  %v808_v39 = vsel %vm806_vm8, %v801_v12, %v1881_v49  ;;  %v809_v38 = vsel %vm806_vm8, %v2000_v41, %v801_v12 }
 0x19f   : > { %v829_v37 = vmul.f32 %v2099_v42, %v807_v34  ;;  %v830_v23 = vmul.f32 %v2102_v52, %v810_v36  ;;  %v827_v40 = vmul.f32 %v2105_v32, %v809_v38  ;;  %v828_v59 = vmul.f32 %v2108_v46, %v808_v39 }
 0x1a0   : > { %1584 = vmatpush1.bf16.msra.mxu1 %v1583_v44  ;;  %1568 = vmatpush1.bf16.msra.mxu0 %v1567_v47  ;;  %v414_v44 = vld [vmem:[%s2379_s4] sm:$0xff]  ;;  %v2392_v47 = vmov 0.0  }
 0x1a1   : > { %v1587_v49 = vpack.c.bf16 %v829_v37, %v796_v6  ;;  %v1571_v50 = vpack.c.bf16 %v827_v40, %v794_v8  ;;  %v836_v51 = vpop.permute.xlu1 %835  ;;  %v834_v7 = vpop.permute.xlu0 %833  ;;  %v1569_v41 = vpack.c.bf16 %v828_v59, %v795_v10  ;;  %v1585_v3 = vpack.c.bf16 %v830_v23, %v797_v57 }
 0x1a2   : > { %v841_v4 = vsel %vm839_vm9, %v834_v7, %v836_v51  ;;  %v1668_v23 = vmov 0  }
 0x1a3   : > { %v861_v18 = vmul.f32 %v2137_v11, %v841_v4  ;;  %1570 = vmatprep.subr.bf16.mxu0 %v1569_v41  ;;  %1586 = vmatprep.subr.bf16.mxu1 %v1585_v3 }
 0x1a4   : > { %1572 = vmatpush1.bf16.msra.mxu0 %v1571_v50  ;;  %1588 = vmatpush1.bf16.msra.mxu1 %v1587_v49 }
 0x1a5   : > { %v838_v58 = vpop.permute.xlu1 %837  ;;  %884 = vmatprep.subr.mxu0 %v861_v18  ;;  %v832_v9 = vpop.permute.xlu0 %831  ;;  %1639 = vset.pattern.permute.xlu1 %v1668_v23 }
 0x1a6   : > { %v840_v30 = vsel %vm839_vm9, %v836_v51, %v838_v58  ;;  %v842_v54 = vsel %vm839_vm9, %v832_v9, %v834_v7  ;;  %v843_v27 = vsel %vm839_vm9, %v838_v58, %v832_v9  ;;  %1640 = vset.pattern.permute.xlu0 %v1668_v23 }
 0x1a7   : > { %v862_v0 = vmul.f32 %v2145_v24, %v840_v30  ;;  %v860_v13 = vmul.f32 %v2150_v53, %v842_v54  ;;  %v863_v28 = vmul.f32 %v2155_v45, %v843_v27 }
 0x1a9   : > { %885 = vmatpush1.msra.mxu0 %v860_v13  ;;  %955 = vmatprep.subr.mxu1 %v863_v28  ;;  %v416_v13 = vld [vmem:[%s2380_s5] sm:$0xff] }
 0x1aa   : > { %1515 = vmatmul.mubr.msk.f32.vlgmr.msra.gmra.mrb[2].mxu0 %vm864_vm10, %v414_v44  ;;  %956 = vmatpush1.msra.mxu1 %v862_v0 }
 0x1ab   : > { %1516 = vmatmul.mubr.msk.f32.vlgmr.msra.gmra.mrb[2].mxu1 %vm864_vm10, %v414_v44  ;;  %1273 = vmatprep.mubr.f32.mxu0 %v2392_v47 }
 0x1ac   : > { %1344 = vmatprep.mubr.f32.mxu1 %v2392_v47  ;;  %v417_v47 = vld [vmem:[%s2381_s6] sm:$0xff] }
 0x27d   : > { %v934_v21 = vpop.f32.mrb[2].mxu0 }
 0x27e   : > { %v936_v6 = vpop.f32.mrb[3].mxu0  ;;  %v1005_v57 = vpop.f32.mrb[2].mxu1  ;;  %v1013_v8 = vmul.f32 %v934_v21, %v934_v21 }
 0x27f   : > { %v1010_v10 = vadd.f32 %v936_v6, %v934_v21  ;;  %v2173_v5 = vpop.f32.mrb[3].mxu1  ;;  %v1014_v12 = vmul.f32 %v936_v6, %v936_v6  ;;  %v1047_v34 = vmul.f32 %v1005_v57, %v1005_v57 }
 0x280   : > { %v1044_v36 = vadd.f32 %v2173_v5, %v1005_v57  ;;  %v1048_v39 = vmul.f32 %v2173_v5, %v2173_v5 }
 0x281   : > { %1011 = vadd.xlane.f32.xlu0 %v1010_v10  ;;  %v1015_v38 = vadd.f32 %v1014_v12, %v1013_v8 }
 0x282   : > { %1045 = vadd.xlane.f32.xlu1 %v1044_v36  ;;  %v1049_v37 = vadd.f32 %v1048_v39, %v1047_v34 }
 0x285   : > { %1016 = vadd.xlane.f32.xlu0 %v1015_v38 }
 0x289   : > { %1050 = vadd.xlane.f32.xlu0 %v1049_v37 }
 0x30e   : > { %v1012_v40 = vpop.xlane.xlu0 %1011 }
 0x30f   : > { %v1018_v59 = vmul.f32 0.00390625, %v1012_v40  ;;  %v1046_v49 = vpop.xlane.xlu1 %1045 }
 0x310   : > { %v1052_v50 = vmul.f32 0.00390625, %v1046_v49 }
 0x311   : > { %v1020_v7 = vmul.f32 %v1018_v59, %v1018_v59 }
 0x312   : > { %v1017_v51 = vpop.xlane.xlu0 %1016  ;;  %v1054_v4 = vmul.f32 %v1052_v50, %v1052_v50 }
 0x313   : > { %v1019_v41 = vmul.f32 0.00390625, %v1017_v51 }
 0x315   : > { %v1021_v3 = vsub.f32 %v1019_v41, %v1020_v7 }
 0x316   : > { %v1051_v18 = vpop.xlane.xlu0 %1050 }
 0x317   : > { %v1022_v58 = vmax.f32 %v1021_v3, 0.0  ;;  %v1053_v9 = vmul.f32 0.00390625, %v1051_v18 }
 0x319   : > { %v1023_v30 = vadd.f32 1e-05, %v1022_v58  ;;  %v1055_v54 = vsub.f32 %v1053_v9, %v1054_v4 }
 0x31b   : > { %1643 = vrsqrt.f32 %v1023_v30  ;;  %v1056_v27 = vmax.f32 %v1055_v54, 0.0 }
 0x31d   : > { %v1057_v0 = vadd.f32 1e-05, %v1056_v27 }
 0x31f   : > { %1645 = vrsqrt.f32 %v1057_v0 }
 0x325   : > { %v1644_v28 = vpop.eup %1643 }
 0x326   : > { %v1025_v44 = vmul.f32 %v1644_v28, %v416_v13 }
 0x328   : > { %1030 = vperm.xlu1 %1639, %v1025_v44   ;;  %v1026_v8 = vmul.f32 %v1025_v44, %v1018_v59 }
 0x329   : > { %v1646_v10 = vpop.eup %1645 }
 0x32a   : > { %v1027_v12 = vsub.f32 %v417_v47, %v1026_v8  ;;  %v1059_v34 = vmul.f32 %v1646_v10, %v416_v13 }
 0x32c   : > { %1037 = vperm.xlu1 %1639, %v1027_v12   ;;  %1064 = vperm.xlu0 %1640, %v1059_v34   ;;  %v1060_v36 = vmul.f32 %v1059_v34, %v1052_v50 }
 0x32e   : > { %v1061_v39 = vsub.f32 %v417_v47, %v1060_v36 }
 0x330   : > { %1071 = vperm.xlu1 %1639, %v1061_v39  }
 0x3a7   : > { %v1031_v38 = vpop.permute.xlu1 %1030 }
 0x3a8   : > { %v1033_v37 = vmul.f32 %v1031_v38, %v934_v21  ;;  %v1034_v49 = vmul.f32 %v1031_v38, %v936_v6 }
 0x3ab   : > { %v1038_v23 = vpop.permute.xlu1 %1037  ;;  %v1065_v40 = vpop.permute.xlu0 %1064 }
 0x3ac   : > { %v1040_v51 = vadd.f32 %v1038_v23, %v1033_v37  ;;  %v1041_v7 = vadd.f32 %v1038_v23, %v1034_v49  ;;  %v1067_v3 = vmul.f32 %v1065_v40, %v1005_v57  ;;  %v1068_v21 = vmul.f32 %v1065_v40, %v2173_v5 }
 0x3ae   : > { %v2184_v41 = vmax.f32 %v1040_v51, 0.0  ;;  %v2188_v18 = vmax.f32 %v1041_v7, 0.0 }
 0x3af   : > { %v1072_v4 = vpop.permute.xlu1 %1071 }
 0x3b0   : > { %v1074_v59 = vadd.f32 %v1072_v4, %v1067_v3  ;;  %1078 = vrot.lane.b32.xlu1 %v2184_v41, %s1661_s20  ;;  %v1075_v6 = vadd.f32 %v1072_v4, %v1068_v21 }
 0x3b2   : > { %v2190_v50 = vmax.f32 %v1074_v59, 0.0  ;;  %v2209_v57 = vmax.f32 %v1075_v6, 0.0 }
 0x3b4   : > { %1080 = vrot.lane.b32.xlu1 %v2188_v18, %s1661_s20  ;;  %1098 = vrot.lane.b32.xlu0 %v2190_v50, %s1660_s19 }
 0x3b8   : > { %1094 = vrot.lane.b32.xlu1 %v2184_v41, %s1660_s19  ;;  %1110 = vrot.lane.b32.xlu0 %v2184_v41, %s1665_s25 }
 0x3bc   : > { %1096 = vrot.lane.b32.xlu1 %v2188_v18, %s1660_s19  ;;  %1126 = vrot.lane.b32.xlu0 %v2184_v41, %s1666_s26 }
 0x3c0   : > { %1114 = vrot.lane.b32.xlu0 %v2190_v50, %s1665_s25  ;;  %1082 = vrot.lane.b32.xlu1 %v2190_v50, %s1661_s20 }
 0x3c4   : > { %1130 = vrot.lane.b32.xlu0 %v2190_v50, %s1666_s26  ;;  %1084 = vrot.lane.b32.xlu1 %v2209_v57, %s1661_s20 }
 0x3c8   : > { %1144 = vrot.lane.b32.xlu0 %v2188_v18, %s1662_s22  ;;  %1100 = vrot.lane.b32.xlu1 %v2209_v57, %s1660_s19 }
 0x3cc   : > { %1142 = vrot.lane.b32.xlu0 %v2184_v41, %s1662_s22  ;;  %1112 = vrot.lane.b32.xlu1 %v2188_v18, %s1665_s25 }
 0x3d0   : > { %1160 = vrot.lane.b32.xlu0 %v2188_v18, %s1663_s23  ;;  %1128 = vrot.lane.b32.xlu1 %v2188_v18, %s1666_s26 }
 0x3d4   : > { %1176 = vrot.lane.b32.xlu0 %v2188_v18, %s1664_s24  ;;  %1116 = vrot.lane.b32.xlu1 %v2209_v57, %s1665_s25 }
 0x3d8   : > { %1158 = vrot.lane.b32.xlu0 %v2184_v41, %s1663_s23  ;;  %1132 = vrot.lane.b32.xlu1 %v2209_v57, %s1666_s26  ;;  %s1524_s26 = sshll.u32 %s2396_s21, 4 }
 0x3d9   : > { %s388_s11 = scalar_lea.vmem %s2385_s10, %s1524_s26 }
 0x3dc   : > { %1174 = vrot.lane.b32.xlu0 %v2184_v41, %s1664_s24  ;;  %1146 = vrot.lane.b32.xlu1 %v2190_v50, %s1662_s22 }
 0x3e0   : > { %1192 = vrot.lane.b32.xlu0 %v2188_v18, %s1667_s27  ;;  %1148 = vrot.lane.b32.xlu1 %v2209_v57, %s1662_s22 }
 0x3e4   : > { %1190 = vrot.lane.b32.xlu0 %v2184_v41, %s1667_s27  ;;  %1162 = vrot.lane.b32.xlu1 %v2190_v50, %s1663_s23 }
 0x3e8   : > { %1178 = vrot.lane.b32.xlu1 %v2190_v50, %s1664_s24 }
 0x3ec   : > { %1164 = vrot.lane.b32.xlu1 %v2209_v57, %s1663_s23 }
 0x3f0   : > { %1180 = vrot.lane.b32.xlu1 %v2209_v57, %s1664_s24 }
 0x3f4   : > { %1194 = vrot.lane.b32.xlu1 %v2190_v50, %s1667_s27 }
 0x3f8   : > { %1196 = vrot.lane.b32.xlu1 %v2209_v57, %s1667_s27 }
 0x422   : > { %v1079_v5 = vpop.permute.xlu1 %1078 }
 0x426   : > { %v1099_v58 = vpop.permute.xlu0 %1098  ;;  %v1081_v9 = vpop.permute.xlu1 %1080 }
 0x427   : > { %v1088_v27 = vsel %vm608_vm2, %v1079_v5, %v1081_v9 }
 0x428   : > { %v1091_v44 = vmul.f32 %v1088_v27, %v1982_v31 }
 0x42a   : > { %v1111_v30 = vpop.permute.xlu0 %1110  ;;  %v1095_v54 = vpop.permute.xlu1 %1094 }
 0x42e   : > { %v1127_v0 = vpop.permute.xlu0 %1126  ;;  %v1097_v13 = vpop.permute.xlu1 %1096 }
 0x42f   : > { %v1104_v28 = vsel %vm641_vm3, %v1095_v54, %v1097_v13  ;;  %v1103_v31 = vsel %vm641_vm3, %v1097_v13, %v1099_v58 }
 0x430   : > { %v1107_v47 = vmul.f32 %v1104_v28, %v1937_v14  ;;  %v1108_v21 = vmul.f32 %v1103_v31, %v1940_v15  ;;  %v2393_v31 = vld [vmem:[#allocation2_spill] sm:$0xff] }
 0x432   : > { %v1115_v8 = vpop.permute.xlu0 %1114  ;;  %v1083_v10 = vpop.permute.xlu1 %1082  ;;  %v1589_v12 = vpack.c.bf16 %v1107_v47, %v1091_v44 }
 0x433   : > { %v1087_v39 = vsel %vm608_vm2, %v1081_v9, %v1083_v10 }
 0x434   : > { %1590 = vmatprep.subr.bf16.mxu0 %v1589_v12  ;;  %v1092_v40 = vmul.f32 %v1087_v39, %v1988_v33 }
 0x436   : > { %v1131_v34 = vpop.permute.xlu0 %1130  ;;  %v1085_v36 = vpop.permute.xlu1 %1084  ;;  %v1607_v27 = vpack.c.bf16 %v1108_v21, %v1092_v40  ;;  %v2394_v40 = vld [vmem:[#allocation3_spill] sm:$0xff] }
 0x437   : > { %v1086_v38 = vsel %vm608_vm2, %v1083_v10, %v1085_v36  ;;  %v1089_v37 = vsel %vm608_vm2, %v1085_v36, %v1079_v5 }
 0x438   : > { %v1090_v7 = vmul.f32 %v1089_v37, %v1943_v16  ;;  %v1093_v3 = vmul.f32 %v1086_v38, %v1902_v61 }
 0x43a   : > { %v1145_v23 = vpop.permute.xlu0 %1144  ;;  %v1101_v14 = vpop.permute.xlu1 %1100 }
 0x43b   : > { %v1102_v49 = vsel %vm641_vm3, %v1099_v58, %v1101_v14  ;;  %v1105_v51 = vsel %vm641_vm3, %v1101_v14, %v1095_v54 }
 0x43c   : > { %v1106_v4 = vmul.f32 %v1105_v51, %v1946_v17  ;;  %v1109_v59 = vmul.f32 %v1102_v49, %v1905_v62 }
 0x43e   : > { %v1591_v6 = vpack.c.bf16 %v1106_v4, %v1090_v7  ;;  %v1143_v5 = vpop.permute.xlu0 %1142  ;;  %v1113_v9 = vpop.permute.xlu1 %1112  ;;  %v1605_v33 = vpack.c.bf16 %v1109_v59, %v1093_v3 }
 0x43f   : > { %v1120_v58 = vsel %vm674_vm4, %v1111_v30, %v1113_v9  ;;  %v1119_v12 = vsel %vm674_vm4, %v1113_v9, %v1115_v8 }
 0x440   : > { %1592 = vmatpush1.bf16.msra.mxu0 %v1591_v6  ;;  %1606 = vmatprep.subr.bf16.mxu1 %v1605_v33  ;;  %v1123_v62 = vmul.f32 %v1120_v58, %v1951_v19  ;;  %v1152_v19 = vsel %vm740_vm6, %v1143_v5, %v1145_v23  ;;  %v1124_v49 = vmul.f32 %v1119_v12, %v1954_v20 }
 0x441   : > { %1608 = vmatpush1.bf16.msra.mxu1 %v1607_v27 }
 0x442   : > { %v1129_v16 = vpop.permute.xlu1 %1128  ;;  %v1161_v54 = vpop.permute.xlu0 %1160 }
 0x443   : > { %v1136_v61 = vsel %vm707_vm5, %v1127_v0, %v1129_v16  ;;  %v1135_v28 = vsel %vm707_vm5, %v1129_v16, %v1131_v34 }
 0x444   : > { %v1139_v15 = vmul.f32 %v1136_v61, %v1960_v22  ;;  %v1140_v22 = vmul.f32 %v1135_v28, %v1966_v25  ;;  %v1154_v25 = vmul.f32 %v1152_v19, %v2009_v60 }
 0x446   : > { %v1117_v17 = vpop.permute.xlu1 %1116  ;;  %v1593_v13 = vpack.c.bf16 %v1139_v15, %v1123_v62  ;;  %v1177_v44 = vpop.permute.xlu0 %1176  ;;  %v1611_v4 = vpack.c.bf16 %v1140_v22, %v1124_v49  ;;  %v1599_v20 = vpack.c.bf16 %v1154_v25, %v2184_v41 }
 0x447   : > { %v1118_v47 = vsel %vm674_vm4, %v1115_v8, %v1117_v17  ;;  %v1121_v10 = vsel %vm674_vm4, %v1117_v17, %v1111_v30 }
 0x448   : > { %1594 = vmatprep.subr.bf16.mxu0 %v1593_v13  ;;  %v1122_v37 = vmul.f32 %v1121_v10, %v1969_v26  ;;  %v1125_v14 = vmul.f32 %v1118_v47, %v2393_v31 }
 0x44a   : > { %v1133_v36 = vpop.permute.xlu1 %1132 }
 0x44b   : > { %v1134_v39 = vsel %vm707_vm5, %v1131_v34, %v1133_v36  ;;  %v1137_v38 = vsel %vm707_vm5, %v1133_v36, %v1127_v0  ;;  %v1159_v34 = vpop.permute.xlu0 %1158 }
 0x44c   : > { %v1138_v30 = vmul.f32 %v1137_v38, %v1976_v29  ;;  %v1141_v8 = vmul.f32 %v1134_v39, %v2394_v40 }
 0x44e   : > { %v1595_v51 = vpack.c.bf16 %v1138_v30, %v1122_v37  ;;  %v1147_v7 = vpop.permute.xlu1 %1146  ;;  %v1609_v3 = vpack.c.bf16 %v1141_v8, %v1125_v14 }
 0x44f   : > { %v1151_v0 = vsel %vm740_vm6, %v1145_v23, %v1147_v7 }
 0x450   : > { %v1155_v26 = vmul.f32 %v1151_v0, %v2012_v48  ;;  %1596 = vmatpush1.bf16.msra.mxu0 %v1595_v51  ;;  %1610 = vmatprep.subr.bf16.mxu1 %v1609_v3  ;;  %v1175_v48 = vpop.permute.xlu0 %1174 }
 0x451   : > { %1612 = vmatpush1.bf16.msra.mxu1 %v1611_v4  ;;  %v1184_v41 = vsel %vm806_vm8, %v1175_v48, %v1177_v44 }
 0x452   : > { %v1149_v29 = vpop.permute.xlu1 %1148  ;;  %v1597_v59 = vpack.c.bf16 %v1155_v26, %v2188_v18 }
 0x453   : > { %v1150_v21 = vsel %vm740_vm6, %v1147_v7, %v1149_v29  ;;  %v1153_v60 = vsel %vm740_vm6, %v1149_v29, %v1143_v5  ;;  %v1186_v5 = vmul.f32 %v1184_v41, %v2105_v32  ;;  %v418_v41 = vld [vmem:[%s2383_s8] sm:$0xff] }
 0x454   : > { %v1156_v6 = vmul.f32 %v1150_v21, %v1992_v35  ;;  %v1157_v23 = vmul.f32 %v1153_v60, %v2003_v56  ;;  %1598 = vmatprep.subr.bf16.mxu0 %v1597_v59  ;;  %v1168_v35 = vsel %vm773_vm7, %v1159_v34, %v1161_v54  ;;  %v1193_v61 = vpop.permute.xlu0 %1192 }
 0x455   : > { %1600 = vmatpush1.bf16.msra.mxu0 %v1599_v20  ;;  %v1170_v16 = vmul.f32 %v1168_v35, %v2023_v1 }
 0x456   : > { %v1615_v9 = vpack.c.bf16 %v1156_v6, %v2190_v50  ;;  %v1163_v33 = vpop.permute.xlu1 %1162  ;;  %v1613_v18 = vpack.c.bf16 %v1157_v23, %v2209_v57 }
 0x457   : > { %v1167_v27 = vsel %vm773_vm7, %v1161_v54, %v1163_v33  ;;  %v1603_v17 = vpack.c.bf16 %v1186_v5, %v1170_v16 }
 0x458   : > { %1614 = vmatprep.subr.bf16.mxu1 %v1613_v18  ;;  %v1171_v58 = vmul.f32 %v1167_v27, %v2026_v2  ;;  %v1191_v28 = vpop.permute.xlu0 %1190 }
 0x459   : > { %1616 = vmatpush1.bf16.msra.mxu1 %v1615_v9  ;;  %v1200_v12 = vsel %vm839_vm9, %v1191_v28, %v1193_v61 }
 0x45a   : > { %v1179_v56 = vpop.permute.xlu1 %1178 }
 0x45b   : > { %v1183_v50 = vsel %vm806_vm8, %v1177_v44, %v1179_v56 }
 0x45c   : > { %v1187_v57 = vmul.f32 %v1183_v50, %v2108_v46 }
 0x45e   : > { %v1165_v62 = vpop.permute.xlu1 %1164  ;;  %v1601_v15 = vpack.c.bf16 %v1187_v57, %v1171_v58 }
 0x45f   : > { %v1166_v54 = vsel %vm773_vm7, %v1163_v33, %v1165_v62  ;;  %v1169_v32 = vsel %vm773_vm7, %v1165_v62, %v1159_v34 }
 0x460   : > { %1602 = vmatprep.subr.bf16.mxu0 %v1601_v15  ;;  %v1172_v46 = vmul.f32 %v1166_v54, %v2015_v43  ;;  %v1173_v44 = vmul.f32 %v1169_v32, %v2020_v63  ;;  %v1202_v43 = vmul.f32 %v2150_v53, %v1200_v12  ;;  %v415_v63 = vld [vmem:[%s2382_s7] sm:$0xff] }
 0x461   : > { %1604 = vmatpush1.bf16.msra.mxu0 %v1603_v17 }
 0x462   : > { %v1181_v13 = vpop.permute.xlu1 %1180 }
 0x463   : > { %v1182_v2 = vsel %vm806_vm8, %v1179_v56, %v1181_v13  ;;  %v1185_v1 = vsel %vm806_vm8, %v1181_v13, %v1175_v48  ;;  %v419_v56 = vld [vmem:[%s2384_s9] sm:$0xff] }
 0x464   : > { %v1188_v47 = vmul.f32 %v1182_v2, %v2099_v42  ;;  %v1189_v10 = vmul.f32 %v1185_v1, %v2102_v52 }
 0x466   : > { %v1619_v36 = vpack.c.bf16 %v1188_v47, %v1172_v46  ;;  %v1195_v19 = vpop.permute.xlu1 %1194  ;;  %v1617_v22 = vpack.c.bf16 %v1189_v10, %v1173_v44 }
 0x467   : > { %v1199_v39 = vsel %vm839_vm9, %v1193_v61, %v1195_v19 }
 0x468   : > { %v1203_v38 = vmul.f32 %v2137_v11, %v1199_v39  ;;  %1618 = vmatprep.subr.bf16.mxu1 %v1617_v22 }
 0x469   : > { %1620 = vmatpush1.bf16.msra.mxu1 %v1619_v36 }
 0x46a   : > { %1225 = vmatprep.subr.mxu0 %v1203_v38  ;;  %v1197_v42 = vpop.permute.xlu1 %1196 }
 0x46b   : > { %v1198_v52 = vsel %vm839_vm9, %v1195_v19, %v1197_v42  ;;  %v1201_v37 = vsel %vm839_vm9, %v1197_v42, %v1191_v28  ;;  %1226 = vmatpush1.msra.mxu0 %v1202_v43 }
 0x46c   : > { %v1204_v31 = vmul.f32 %v2145_v24, %v1198_v52  ;;  %v1205_v11 = vmul.f32 %v2155_v45, %v1201_v37  ;;  %1517 = vmatmul.mubr.msk.f32.vlgmr.msra.gmra.mrb[4].mxu0 %vm864_vm10, %v415_v63 }
 0x46e   : > { %1296 = vmatprep.subr.mxu1 %v1205_v11 }
 0x46f   : > { %1297 = vmatpush1.msra.mxu1 %v1204_v31 }
 0x470   : > { %1518 = vmatmul.mubr.msk.f32.vlgmr.msra.gmra.mrb[4].mxu1 %vm864_vm10, %v415_v63 }
 0x53f   : > { %v1275_v53 = vpop.f32.mrb[4].mxu0 }
 0x540   : > { %v1277_v14 = vpop.f32.mrb[5].mxu0  ;;  %v1354_v30 = vmul.f32 %v1275_v53, %v1275_v53 }
 0x541   : > { %v1355_v40 = vmul.f32 %v1277_v14, %v1277_v14  ;;  %v1351_v8 = vadd.f32 %v1277_v14, %v1275_v53 }
 0x543   : > { %1352 = vadd.xlane.f32.xlu0 %v1351_v8  ;;  %v1346_v49 = vpop.f32.mrb[4].mxu1  ;;  %v1356_v55 = vadd.f32 %v1355_v40, %v1354_v30 }
 0x544   : > { %v1348_v51 = vpop.f32.mrb[5].mxu1  ;;  %v1390_v7 = vmul.f32 %v1346_v49, %v1346_v49 }
 0x545   : > { %v1391_v3 = vmul.f32 %v1348_v51, %v1348_v51  ;;  %v1387_v24 = vadd.f32 %v1348_v51, %v1346_v49 }
 0x547   : > { %1357 = vadd.xlane.f32.xlu0 %v1356_v55  ;;  %1388 = vadd.xlane.f32.xlu1 %v1387_v24  ;;  %v1392_v45 = vadd.f32 %v1391_v3, %v1390_v7 }
 0x54b   : > { %1393 = vadd.xlane.f32.xlu0 %v1392_v45 }
 0x5d0   : > { %v1353_v25 = vpop.xlane.xlu0 %1352 }
 0x5d1   : > { %v1359_v4 = vmul.f32 0.00390625, %v1353_v25 }
 0x5d3   : > { %v1361_v26 = vmul.f32 %v1359_v4, %v1359_v4 }
 0x5d4   : > { %v1358_v34 = vpop.xlane.xlu0 %1357  ;;  %v1389_v0 = vpop.xlane.xlu1 %1388 }
 0x5d5   : > { %v1360_v29 = vmul.f32 0.00390625, %v1358_v34  ;;  %v1395_v59 = vmul.f32 0.00390625, %v1389_v0 }
 0x5d7   : > { %v1362_v20 = vsub.f32 %v1360_v29, %v1361_v26  ;;  %v1397_v21 = vmul.f32 %v1395_v59, %v1395_v59 }
 0x5d8   : > { %v1394_v60 = vpop.xlane.xlu0 %1393 }
 0x5d9   : > { %v1363_v6 = vmax.f32 %v1362_v20, 0.0  ;;  %v1396_v23 = vmul.f32 0.00390625, %v1394_v60 }
 0x5db   : > { %v1364_v48 = vadd.f32 1e-05, %v1363_v6  ;;  %v1398_v9 = vsub.f32 %v1396_v23, %v1397_v21 }
 0x5dd   : > { %1647 = vrsqrt.f32 %v1364_v48  ;;  %v1399_v33 = vmax.f32 %v1398_v9, 0.0 }
 0x5df   : > { %v1400_v18 = vadd.f32 1e-05, %v1399_v33 }
 0x5e1   : > { %1649 = vrsqrt.f32 %v1400_v18 }
 0x5e7   : > { %v1648_v27 = vpop.eup %1647 }
 0x5e8   : > { %v1366_v35 = vmul.f32 %v1648_v27, %v418_v41 }
 0x5ea   : > { %1371 = vperm.xlu1 %1639, %v1366_v35   ;;  %v1367_v5 = vmul.f32 %v1366_v35, %v1359_v4 }
 0x5eb   : > { %v1650_v50 = vpop.eup %1649 }
 0x5ec   : > { %v1368_v58 = vsub.f32 %v419_v56, %v1367_v5  ;;  %v1402_v57 = vmul.f32 %v1650_v50, %v418_v41 }
 0x5ee   : > { %1378 = vperm.xlu0 %1640, %v1368_v58   ;;  %1407 = vperm.xlu1 %1639, %v1402_v57   ;;  %v1403_v16 = vmul.f32 %v1402_v57, %v1395_v59 }
 0x5f0   : > { %v1404_v61 = vsub.f32 %v419_v56, %v1403_v16 }
 0x5f2   : > { %1414 = vperm.xlu1 %1639, %v1404_v61  }
 0x669   : > { %v1372_v62 = vpop.permute.xlu1 %1371 }
 0x66a   : > { %v1374_v15 = vmul.f32 %v1372_v62, %v1275_v53  ;;  %v1375_v17 = vmul.f32 %v1372_v62, %v1277_v14 }
 0x66d   : > { %v1379_v54 = vpop.permute.xlu0 %1378  ;;  %v1408_v32 = vpop.permute.xlu1 %1407 }
 0x66e   : > { %v1381_v13 = vadd.f32 %v1379_v54, %v1374_v15  ;;  %v1382_v28 = vadd.f32 %v1379_v54, %v1375_v17  ;;  %v1410_v46 = vmul.f32 %v1408_v32, %v1346_v49  ;;  %v1411_v44 = vmul.f32 %v1408_v32, %v1348_v51 }
 0x670   : > { %v1383_v2 = vmax.f32 %v1381_v13, 0.0  ;;  %v1384_v1 = vmax.f32 %v1382_v28, 0.0 }
 0x671   : > { %v1415_v47 = vpop.permute.xlu1 %1414 }
 0x672   : > { %1385 = vst [vmem:[%s388_s11] sm:$0xff] %v1383_v2  ;;  %1386 = vst [vmem:[%s388_s11 + $0x8] sm:$0xff] %v1384_v1  ;;  %v1417_v10 = vadd.f32 %v1415_v47, %v1410_v46  ;;  %v1418_v12 = vadd.f32 %v1415_v47, %v1411_v44 }
 0x674   : > { %v1419_v36 = vmax.f32 %v1417_v10, 0.0  ;;  %v1420_v19 = vmax.f32 %v1418_v12, 0.0 }
 0x676   : > { %1519 = vst [vmem:[%s388_s11 + $0x10] sm:$0xff] %v1419_v36  ;;  %1520 = vst [vmem:[%s388_s11 + $0x18] sm:$0xff] %v1420_v19 }
 0x677 PF: > { %s20_s13 = sadd.s32 1, %s1657_s13  }
 0x678   : > { %p17_p4 = scmp.ge.s32.totalorder %s20_s13, 4  }
 0x67a   :  { %19 = sbr.rel (!%p17_p4) target bundleno = 1 (0x1), region = 96 }

</bundles_post_ra>
